<compile_context>
chip_gen: v6e
topology: v6e:2x2x1
jax: 0.10.0
libtpu: 0.0.40
codegen_flags: <defaults>
</compile_context>

<pallas_src>
import jax
import jax.numpy as jnp
from jax.experimental import pallas as pl
from jax.experimental.pallas import tpu as pltpu


# ----------------------------------------------------------------------------
# Pallas kernel factory: 1x1 conv chain + clamp/sigmoid + reparameterized Z +
# feature-wise KL capacity + batch-mean reduction of the capacity.
# Channel-major blocks: (C, TP) with TP pixels on the lane axis.
# ----------------------------------------------------------------------------
def _make_ib_kernel(use_inkernel_prng, inv_nb):
    def kernel(*refs):
        if use_inkernel_prng:
            (seed_ref, readout_ref, r_ref, mr_ref, sr_ref, act_ref,
             w1_ref, b1_ref, w2_ref, b2_ref, w3_ref, b3_ref,
             z_ref, lam_ref, info_ref) = refs
        else:
            (readout_ref, r_ref, eps_ref, mr_ref, sr_ref, act_ref,
             w1_ref, b1_ref, w2_ref, b2_ref, w3_ref, b3_ref,
             z_ref, lam_ref, info_ref) = refs

        b = pl.program_id(1)            # batch index (reduction axis for info)
        nb = pl.num_programs(1)

        # ---- alpha = conv3(relu(conv2(relu(conv1(readout))))) as matmuls ----
        x = readout_ref[0]                                        # (in_c, TP)
        h = jnp.dot(w1_ref[...], x,
                    preferred_element_type=jnp.float32) + b1_ref[...]
        h = jnp.maximum(h, 0.0)
        h = jnp.dot(w2_ref[...], h,
                    preferred_element_type=jnp.float32) + b2_ref[...]
        h = jnp.maximum(h, 0.0)
        alpha = jnp.dot(w3_ref[...], h,
                        preferred_element_type=jnp.float32) + b3_ref[...]
        alpha = jnp.clip(alpha, -5.0, 5.0)                        # _alpha_bound

        # kernel_size=1 Gaussian smooth is statically the identity -> skipped.
        lam = jax.nn.sigmoid(alpha)                               # (out_c, TP)

        # ---- reparameterization + KL capacity ----
        r = r_ref[0]                                              # (out_c, TP)
        mr = mr_ref[...]
        sr = sr_ref[...]
        act = act_ref[...]                                        # (out_c, 1)

        if use_inkernel_prng:
            # Distinct stream per (pixel-tile, batch) grid point.
            pltpu.prng_seed(seed_ref[0] + pl.program_id(0) * nb + b)
            noise = pltpu.stateful_normal(r.shape, jnp.float32)
        else:
            noise = eps_ref[0]

        eps = noise * sr + mr                                     # randn*std + mean
        one_m_lam = 1.0 - lam
        z = (r * lam + one_m_lam * eps) * act

        inv_sr = pl.reciprocal(sr, approx=True)                   # EUP, ~free
        r_norm = (r - mr) * inv_sr
        var_z = one_m_lam * one_m_lam
        mu_z = r_norm * lam
        cap = -0.5 * (1.0 + jnp.log(var_z) - mu_z * mu_z - var_z) * act

        z_ref[0] = z
        lam_ref[0] = lam

        # info accumulator: output block constant across the batch grid axis.
        @pl.when(b == 0)
        def _():
            info_ref[...] = jnp.zeros_like(info_ref)

        info_ref[...] += cap

        @pl.when(b == nb - 1)
        def _():
            info_ref[...] = info_ref[...] * inv_nb                # batch mean

    return kernel


# ----------------------------------------------------------------------------
# VMEM budgeting / pixel-tile selection.
# ----------------------------------------------------------------------------
def _vmem_limit_bytes():
    # Size the scoped-VMEM request against physical VMEM (64 MiB on v7x,
    # 128 MiB on v5e/v6e), leaving headroom for the compiler.
    try:
        cap = pltpu.get_tpu_info().vmem_capacity_bytes
    except Exception:
        cap = 64 * 1024 * 1024          # conservative default (v7x size)
    return int(min(cap * 3 // 4, 96 * 1024 * 1024))


def _choose_tile_pixels(P, col_bytes, vmem_limit, max_tp=32768):
    """Largest pixel tile that (a) is a multiple of 128 and divides P,
    (b) keeps the double-buffered streaming blocks well inside VMEM, and
    (c) when possible leaves >=2 tiles on the 'parallel' axis (megacore/v7x)."""
    if P % 128 != 0:
        return P                        # full-extent block is always legal
    budget = vmem_limit // 4            # headroom for temporaries / scratch
    cands = [tp for tp in range(128, min(P, max_tp) + 1, 128)
             if P % tp == 0 and 2 * tp * col_bytes <= budget]
    if not cands:
        return 128
    multi = [tp for tp in cands if P // tp >= 2]
    return max(multi) if multi else max(cands)


# ----------------------------------------------------------------------------
# pallas_call builder (shared by the in-kernel-PRNG and host-noise paths).
# ----------------------------------------------------------------------------
def _ib_pallas_call(use_inkernel_prng, readout_cm, r_cm, mr_cm, sr_cm, act_cm,
                    params, noise_arg, *, B, in_c, mid_c, out_c, P, TP,
                    vmem_limit):
    w1, b1, w2, b2, w3, b3 = params
    grid = (P // TP, B)                 # pixel tiles (parallel) x batch (reduce)

    bmap = lambda p, b, *_: (b, 0, p)   # per-batch, per-pixel-tile blocks
    pmap = lambda p, b, *_: (0, p)      # batch-invariant pixel-tile blocks
    fixed = lambda p, b, *_: (0, 0)     # fully resident (weights, masks)

    in_specs = [pl.BlockSpec((1, in_c, TP), bmap),      # readout
                pl.BlockSpec((1, out_c, TP), bmap)]     # R
    inputs = [readout_cm, r_cm]

    if use_inkernel_prng:
        num_prefetch = 1
        prefetch = (noise_arg,)                          # (1,) int32 seed -> SMEM
    else:
        num_prefetch = 0
        prefetch = ()
        in_specs.append(pl.BlockSpec((1, out_c, TP), bmap))   # eps (host noise)
        inputs.append(noise_arg)

    in_specs += [
        pl.BlockSpec((out_c, TP), pmap),          # mean(R)
        pl.BlockSpec((out_c, TP), pmap),          # std(R)
        pl.BlockSpec((out_c, 1), fixed),          # active_neurons
        pl.BlockSpec((mid_c, in_c), fixed),       # W1
        pl.BlockSpec((mid_c, 1), fixed),          # b1
        pl.BlockSpec((2 * out_c, mid_c), fixed),  # W2
        pl.BlockSpec((2 * out_c, 1), fixed),      # b2
        pl.BlockSpec((out_c, 2 * out_c), fixed),  # W3
        pl.BlockSpec((out_c, 1), fixed),          # b3
    ]
    inputs += [mr_cm, sr_cm, act_cm, w1, b1, w2, b2, w3, b3]

    out_shapes = (
        jax.ShapeDtypeStruct((B, out_c, P), jnp.float32),   # Z
        jax.ShapeDtypeStruct((B, out_c, P), jnp.float32),   # lambda
        jax.ShapeDtypeStruct((out_c, P), jnp.float32),      # info (batch mean)
    )
    out_specs = [
        pl.BlockSpec((1, out_c, TP), bmap),
        pl.BlockSpec((1, out_c, TP), bmap),
        pl.BlockSpec((out_c, TP), pmap),          # resident accumulator over b
    ]

    kernel = _make_ib_kernel(use_inkernel_prng, inv_nb=1.0 / B)

    return pl.pallas_call(
        kernel,
        out_shape=out_shapes,
        grid_spec=pltpu.PrefetchScalarGridSpec(
            num_scalar_prefetch=num_prefetch,
            grid=grid,
            in_specs=in_specs,
            out_specs=out_specs,
        ),
        compiler_params=pltpu.CompilerParams(
            dimension_semantics=("parallel", "arbitrary"),
            vmem_limit_bytes=vmem_limit),
    )(*prefetch, *inputs)


# ----------------------------------------------------------------------------
# Plain-JAX glue: bilinear interpolation with align_corners=True (PyTorch's
# F.interpolate(..., mode='bilinear', align_corners=True)).
# ----------------------------------------------------------------------------
def _interp_axis(x, out_size, axis):
    in_size = x.shape[axis]
    if in_size == out_size:
        return x
    if out_size == 1 or in_size == 1:
        idx = jnp.zeros((out_size,), jnp.int32)
        return jnp.take(x, idx, axis=axis)
    pos = jnp.arange(out_size, dtype=jnp.float32) * (in_size - 1) / (out_size - 1)
    lo = jnp.clip(jnp.floor(pos).astype(jnp.int32), 0, in_size - 1)
    hi = jnp.clip(lo + 1, 0, in_size - 1)
    w = (pos - lo.astype(jnp.float32)).astype(x.dtype)
    a = jnp.take(x, lo, axis=axis)
    c = jnp.take(x, hi, axis=axis)
    wshape = [1] * x.ndim
    wshape[axis] = out_size
    w = w.reshape(wshape)
    return a * (1.0 - w) + c * w


def bilinear_align_corners(x, out_h, out_w):
    # x: [B, C, H, W]
    x = _interp_axis(x, out_h, axis=2)
    x = _interp_axis(x, out_w, axis=3)
    return x


# ----------------------------------------------------------------------------
# Wrapper: parameter/stat prep, channel-major reshapes (no transposes),
# tile selection, pallas_call.
# ----------------------------------------------------------------------------
def ib_layer_forward(R, readout_feats, active_neurons, params, noise_key):
    B, out_c, H, W = R.shape
    P = H * W
    mid_c = params[0].shape[0]

    # Batch statistics of R (PyTorch: mean over dim=0, unbiased std).
    m_r = jnp.mean(R, axis=0)                       # (out_c, H, W)
    std_r = jnp.std(R, axis=0, ddof=1)              # (out_c, H, W)

    # Readout features -> bilinear(align_corners=True) -> channel concat.
    readout = jnp.concatenate(
        [bilinear_align_corners(f, H, W) for f in readout_feats], axis=1)
    in_c = readout.shape[1]

    # Channel-major [.., C, P]: NCHW flattens to this with pure reshapes.
    readout_cm = readout.reshape(B, in_c, P)
    r_cm = R.reshape(B, out_c, P)
    mr_cm = m_r.reshape(out_c, P)
    sr_cm = std_r.reshape(out_c, P)
    act_cm = active_neurons.reshape(out_c, 1).astype(jnp.float32)

    vmem_limit = _vmem_limit_bytes()
    col_bytes = 4 * (in_c + 7 * out_c)          # f32 streamed per pixel per step
    TP = _choose_tile_pixels(P, col_bytes, vmem_limit)

    def run(use_inkernel_prng, noise_arg):
        return _ib_pallas_call(
            use_inkernel_prng, readout_cm, r_cm, mr_cm, sr_cm, act_cm,
            params, noise_arg, B=B, in_c=in_c, mid_c=mid_c, out_c=out_c,
            P=P, TP=TP, vmem_limit=vmem_limit)

    try:
        seed = jax.random.randint(noise_key, (1,), 0,
                                  jnp.iinfo(jnp.int32).max, dtype=jnp.int32)
        z_cm, lam_cm, info_cm = run(True, seed)
        jax.block_until_ready((z_cm, lam_cm, info_cm))
    except Exception:
        # Fallback: host-generated standard-normal noise streamed from HBM
        # (only used if the in-kernel stateful PRNG path is unavailable).
        eps = jax.random.normal(noise_key, (B, out_c, P), jnp.float32)
        z_cm, lam_cm, info_cm = run(False, eps)

    # Channel-major == flattened NCHW: pure reshapes back.
    Z = z_cm.reshape(B, out_c, H, W)
    lam = lam_cm.reshape(B, out_c, H, W)
    info = info_cm.reshape(out_c, H, W)
    return Z, lam, info


# ----------------------------------------------------------------------------
# Deterministic parameter init (shapes from IBLayer.__init__; synthetic).
# Conv 1x1 weights stored channel-major as (C_out, C_in); biases (C_out, 1).
# ----------------------------------------------------------------------------
def init_params(key, in_c, out_c):
    mid_c = in_c // 2
    ks = jax.random.split(key, 5)
    scale = 0.1
    w1 = scale * jax.random.normal(ks[0], (mid_c, in_c), jnp.float32)
    b1 = scale * jax.random.normal(ks[1], (mid_c, 1), jnp.float32)
    w2 = scale * jax.random.normal(ks[2], (2 * out_c, mid_c), jnp.float32)
    b2 = scale * jax.random.normal(ks[3], (2 * out_c, 1), jnp.float32)
    # conv3: weight scaled by 0.001, bias = 5.0 (as in the PyTorch __init__).
    w3 = 0.001 * scale * jax.random.normal(ks[4], (out_c, 2 * out_c), jnp.float32)
    b3 = jnp.full((out_c, 1), 5.0, jnp.float32)
    return w1, b1, w2, b2, w3, b3


if __name__ == "__main__":
    key = jax.random.PRNGKey(0)
    k_r, k_f1, k_f2, k_p, k_eps = jax.random.split(key, 5)

    B, out_c, H, W = 2, 4, 16, 16
    in_c = 8                                   # sum of readout feature channels

    R = jax.random.normal(k_r, (B, out_c, H, W), jnp.float32)
    readout_feats = [
        jax.random.normal(k_f1, (B, 4, 8, 8), jnp.float32),    # upsampled to 16x16
        jax.random.normal(k_f2, (B, 4, 16, 16), jnp.float32),  # already at 16x16
    ]
    active_neurons = jnp.array([1.0, 1.0, 0.0, 1.0], jnp.float32)  # (out_c,)

    params = init_params(k_p, in_c, out_c)

    Z, lam, info = ib_layer_forward(R, readout_feats, active_neurons, params, k_eps)
    jax.block_until_ready((Z, lam, info))

    assert Z.shape == (B, out_c, H, W)
    assert lam.shape == (B, out_c, H, W)
    assert info.shape == (out_c, H, W)
    assert bool(jnp.all(jnp.isfinite(Z)))
    assert bool(jnp.all(jnp.isfinite(info)))
    print("KERNEL_OK")
</pallas_src>

<mosaic_0001>
module attributes {stable_mosaic.version = 11 : i64} {
  func.func @kernel(%arg0: i32, %arg1: i32, %arg2: memref<1xi32, #tpu.memory_space<smem>>, %arg3: memref<1x8x128xf32, #tpu.memory_space<vmem>>, %arg4: memref<1x4x128xf32, #tpu.memory_space<vmem>>, %arg5: memref<4x128xf32, #tpu.memory_space<vmem>>, %arg6: memref<4x128xf32, #tpu.memory_space<vmem>>, %arg7: memref<4x1xf32, #tpu.memory_space<vmem>>, %arg8: memref<4x8xf32, #tpu.memory_space<vmem>>, %arg9: memref<4x1xf32, #tpu.memory_space<vmem>>, %arg10: memref<8x4xf32, #tpu.memory_space<vmem>>, %arg11: memref<8x1xf32, #tpu.memory_space<vmem>>, %arg12: memref<4x8xf32, #tpu.memory_space<vmem>>, %arg13: memref<4x1xf32, #tpu.memory_space<vmem>>, %arg14: memref<1x4x128xf32, #tpu.memory_space<vmem>>, %arg15: memref<1x4x128xf32, #tpu.memory_space<vmem>>, %arg16: memref<4x128xf32, #tpu.memory_space<vmem>>) attributes {dimension_semantics = [#tpu.dimension_semantics<parallel>, #tpu.dimension_semantics<arbitrary>], iteration_bounds = array<i64: 2, 2>, scalar_prefetch = 1 : i64, scratch_operands = 0 : i64, tpu.core_type = #tpu.core_type<tc>, window_params = [{transform_indices = @transform_0, window_bounds = array<i64: 1, 8, 128>}, {transform_indices = @transform_1, window_bounds = array<i64: 1, 4, 128>}, {transform_indices = @transform_2, window_bounds = array<i64: 4, 128>}, {transform_indices = @transform_3, window_bounds = array<i64: 4, 128>}, {pipeline_mode = #tpu.pipeline_mode<synchronous>, transform_indices = @transform_4, window_bounds = array<i64: 4, 1>}, {pipeline_mode = #tpu.pipeline_mode<synchronous>, transform_indices = @transform_5, window_bounds = array<i64: 4, 8>}, {pipeline_mode = #tpu.pipeline_mode<synchronous>, transform_indices = @transform_6, window_bounds = array<i64: 4, 1>}, {pipeline_mode = #tpu.pipeline_mode<synchronous>, transform_indices = @transform_7, window_bounds = array<i64: 8, 4>}, {pipeline_mode = #tpu.pipeline_mode<synchronous>, transform_indices = @transform_8, window_bounds = array<i64: 8, 1>}, {pipeline_mode = #tpu.pipeline_mode<synchronous>, transform_indices = @transform_9, window_bounds = array<i64: 4, 8>}, {pipeline_mode = #tpu.pipeline_mode<synchronous>, transform_indices = @transform_10, window_bounds = array<i64: 4, 1>}, {transform_indices = @transform_11, window_bounds = array<i64: 1, 4, 128>}, {transform_indices = @transform_12, window_bounds = array<i64: 1, 4, 128>}, {transform_indices = @transform_13, window_bounds = array<i64: 4, 128>}]} {
    %c0 = arith.constant 0 : index
    %c0_0 = arith.constant 0 : index
    %c0_1 = arith.constant 0 : index
    %0 = vector.load %arg3[%c0, %c0_0, %c0_1] : memref<1x8x128xf32, #tpu.memory_space<vmem>>, vector<1x8x128xf32>
    %1 = vector.shape_cast %0 : vector<1x8x128xf32> to vector<8x128xf32>
    %c0_2 = arith.constant 0 : index
    %c0_3 = arith.constant 0 : index
    %2 = vector.load %arg8[%c0_2, %c0_3] : memref<4x8xf32, #tpu.memory_space<vmem>>, vector<4x8xf32>
    %cst = arith.constant dense<0.000000e+00> : vector<4x128xf32>
    %3 = tpu.matmul %2, %1, %cst {dimension_numbers = #tpu.dot_dimension_numbers<[1], [0], [0], [1], [0, 0, 1, 1], [], []>} : vector<4x8xf32>, vector<8x128xf32>, vector<4x128xf32> -> vector<4x128xf32>
    %c0_4 = arith.constant 0 : index
    %c0_5 = arith.constant 0 : index
    %4 = vector.load %arg9[%c0_4, %c0_5] : memref<4x1xf32, #tpu.memory_space<vmem>>, vector<4x1xf32>
    %5 = vector.broadcast %4 : vector<4x1xf32> to vector<4x128xf32>
    %6 = arith.addf %3, %5 : vector<4x128xf32>
    %cst_6 = arith.constant 0.000000e+00 : f32
    %7 = vector.broadcast %cst_6 : f32 to vector<4x128xf32>
    %8 = arith.maximumf %6, %7 : vector<4x128xf32>
    %c0_7 = arith.constant 0 : index
    %c0_8 = arith.constant 0 : index
    %9 = vector.load %arg10[%c0_7, %c0_8] : memref<8x4xf32, #tpu.memory_space<vmem>>, vector<8x4xf32>
    %cst_9 = arith.constant dense<0.000000e+00> : vector<8x128xf32>
    %10 = tpu.matmul %9, %8, %cst_9 {dimension_numbers = #tpu.dot_dimension_numbers<[1], [0], [0], [1], [0, 0, 1, 1], [], []>} : vector<8x4xf32>, vector<4x128xf32>, vector<8x128xf32> -> vector<8x128xf32>
    %c0_10 = arith.constant 0 : index
    %c0_11 = arith.constant 0 : index
    %11 = vector.load %arg11[%c0_10, %c0_11] : memref<8x1xf32, #tpu.memory_space<vmem>>, vector<8x1xf32>
    %12 = vector.broadcast %11 : vector<8x1xf32> to vector<8x128xf32>
    %13 = arith.addf %10, %12 : vector<8x128xf32>
    %cst_12 = arith.constant 0.000000e+00 : f32
    %14 = vector.broadcast %cst_12 : f32 to vector<8x128xf32>
    %15 = arith.maximumf %13, %14 : vector<8x128xf32>
    %c0_13 = arith.constant 0 : index
    %c0_14 = arith.constant 0 : index
    %16 = vector.load %arg12[%c0_13, %c0_14] : memref<4x8xf32, #tpu.memory_space<vmem>>, vector<4x8xf32>
    %cst_15 = arith.constant dense<0.000000e+00> : vector<4x128xf32>
    %17 = tpu.matmul %16, %15, %cst_15 {dimension_numbers = #tpu.dot_dimension_numbers<[1], [0], [0], [1], [0, 0, 1, 1], [], []>} : vector<4x8xf32>, vector<8x128xf32>, vector<4x128xf32> -> vector<4x128xf32>
    %c0_16 = arith.constant 0 : index
    %c0_17 = arith.constant 0 : index
    %18 = vector.load %arg13[%c0_16, %c0_17] : memref<4x1xf32, #tpu.memory_space<vmem>>, vector<4x1xf32>
    %19 = vector.broadcast %18 : vector<4x1xf32> to vector<4x128xf32>
    %20 = arith.addf %17, %19 : vector<4x128xf32>
    %cst_18 = arith.constant -5.000000e+00 : f32
    %cst_19 = arith.constant 5.000000e+00 : f32
    %21 = vector.broadcast %cst_18 : f32 to vector<4x128xf32>
    %22 = arith.maximumf %21, %20 : vector<4x128xf32>
    %23 = vector.broadcast %cst_19 : f32 to vector<4x128xf32>
    %24 = arith.minimumf %23, %22 : vector<4x128xf32>
    %25 = arith.negf %24 : vector<4x128xf32>
    %26 = math.exp %25 : vector<4x128xf32>
    %cst_20 = arith.constant 1.000000e+00 : f32
    %27 = vector.broadcast %cst_20 : f32 to vector<4x128xf32>
    %28 = arith.addf %27, %26 : vector<4x128xf32>
    %29 = arith.divf %27, %28 : vector<4x128xf32>
    %c0_21 = arith.constant 0 : index
    %c0_22 = arith.constant 0 : index
    %c0_23 = arith.constant 0 : index
    %30 = vector.load %arg4[%c0_21, %c0_22, %c0_23] : memref<1x4x128xf32, #tpu.memory_space<vmem>>, vector<1x4x128xf32>
    %31 = vector.shape_cast %30 : vector<1x4x128xf32> to vector<4x128xf32>
    %c0_24 = arith.constant 0 : index
    %c0_25 = arith.constant 0 : index
    %32 = vector.load %arg5[%c0_24, %c0_25] : memref<4x128xf32, #tpu.memory_space<vmem>>, vector<4x128xf32>
    %c0_26 = arith.constant 0 : index
    %c0_27 = arith.constant 0 : index
    %33 = vector.load %arg6[%c0_26, %c0_27] : memref<4x128xf32, #tpu.memory_space<vmem>>, vector<4x128xf32>
    %c0_28 = arith.constant 0 : index
    %c0_29 = arith.constant 0 : index
    %34 = vector.load %arg7[%c0_28, %c0_29] : memref<4x1xf32, #tpu.memory_space<vmem>>, vector<4x1xf32>
    %c0_30 = arith.constant 0 : index
    %35 = memref.load %arg2[%c0_30] : memref<1xi32, #tpu.memory_space<smem>>
    %c2_i32 = arith.constant 2 : i32
    %36 = arith.muli %arg0, %c2_i32 : i32
    %37 = arith.addi %35, %36 : i32
    %38 = arith.addi %37, %arg1 : i32
    "tpu.prng_set_seed_32"(%38) : (i32) -> ()
    %c0_i32 = arith.constant 0 : i32
    %c0_i32_31 = arith.constant 0 : i32
    %cst_32 = arith.constant -0.99999994 : f32
    %cst_33 = arith.constant 1.000000e+00 : f32
    %39 = vector.broadcast %cst_32 : f32 to vector<1x1xf32>
    %40 = vector.broadcast %cst_33 : f32 to vector<1x1xf32>
    %41 = "tpu.prng_random_bits"() : () -> vector<4x128xi32>
    %c9_i32 = arith.constant 9 : i32
    %42 = vector.broadcast %c9_i32 : i32 to vector<4x128xi32>
    %43 = arith.shrui %41, %42 : vector<4x128xi32>
    %c1065353216_i32 = arith.constant 1065353216 : i32
    %44 = vector.broadcast %c1065353216_i32 : i32 to vector<4x128xi32>
    %45 = arith.ori %43, %44 : vector<4x128xi32>
    %46 = tpu.bitcast %45 : vector<4x128xi32> -> vector<4x128xf32>
    %cst_34 = arith.constant 1.000000e+00 : f32
    %47 = vector.broadcast %cst_34 : f32 to vector<4x128xf32>
    %48 = arith.subf %46, %47 : vector<4x128xf32>
    %49 = arith.subf %40, %39 : vector<1x1xf32>
    %50 = vector.broadcast %49 : vector<1x1xf32> to vector<4x128xf32>
    %51 = arith.mulf %48, %50 : vector<4x128xf32>
    %52 = vector.broadcast %39 : vector<1x1xf32> to vector<4x128xf32>
    %53 = arith.addf %51, %52 : vector<4x128xf32>
    %54 = vector.broadcast %39 : vector<1x1xf32> to vector<4x128xf32>
    %55 = arith.maximumf %54, %53 : vector<4x128xf32>
    %cst_35 = arith.constant 0.000000e+00 : f32
    %56 = vector.broadcast %cst_35 : f32 to vector<4x128xf32>
    %57 = arith.subf %56, %55 : vector<4x128xf32>
    %58 = arith.mulf %55, %57 : vector<4x128xf32>
    %59 = math.log1p %58 : vector<4x128xf32>
    %cst_36 = arith.constant 0.000000e+00 : f32
    %60 = vector.broadcast %cst_36 : f32 to vector<4x128xf32>
    %61 = arith.subf %60, %59 : vector<4x128xf32>
    %cst_37 = arith.constant 5.000000e+00 : f32
    %62 = vector.broadcast %cst_37 : f32 to vector<4x128xf32>
    %63 = arith.cmpf olt, %61, %62 : vector<4x128xf32>
    %cst_38 = arith.constant 2.500000e+00 : f32
    %64 = vector.broadcast %cst_38 : f32 to vector<4x128xf32>
    %65 = arith.subf %61, %64 : vector<4x128xf32>
    %66 = math.sqrt %61 : vector<4x128xf32>
    %cst_39 = arith.constant 3.000000e+00 : f32
    %67 = vector.broadcast %cst_39 : f32 to vector<4x128xf32>
    %68 = arith.subf %66, %67 : vector<4x128xf32>
    %69 = arith.select %63, %65, %68 : vector<4x128xi1>, vector<4x128xf32>
    %cst_40 = arith.constant 2.81022636E-8 : f32
    %cst_41 = arith.constant -2.00214257E-4 : f32
    %70 = vector.broadcast %cst_40 : f32 to vector<4x128xf32>
    %71 = vector.broadcast %cst_41 : f32 to vector<4x128xf32>
    %72 = arith.select %63, %70, %71 : vector<4x128xi1>, vector<4x128xf32>
    %cst_42 = arith.constant 3.43273939E-7 : f32
    %cst_43 = arith.constant 1.00950558E-4 : f32
    %73 = vector.broadcast %cst_42 : f32 to vector<4x128xf32>
    %74 = vector.broadcast %cst_43 : f32 to vector<4x128xf32>
    %75 = arith.select %63, %73, %74 : vector<4x128xi1>, vector<4x128xf32>
    %76 = arith.mulf %72, %69 : vector<4x128xf32>
    %77 = arith.addf %75, %76 : vector<4x128xf32>
    %cst_44 = arith.constant -3.5233877E-6 : f32
    %cst_45 = arith.constant 0.00134934322 : f32
    %78 = vector.broadcast %cst_44 : f32 to vector<4x128xf32>
    %79 = vector.broadcast %cst_45 : f32 to vector<4x128xf32>
    %80 = arith.select %63, %78, %79 : vector<4x128xi1>, vector<4x128xf32>
    %81 = arith.mulf %77, %69 : vector<4x128xf32>
    %82 = arith.addf %80, %81 : vector<4x128xf32>
    %cst_46 = arith.constant -4.39150654E-6 : f32
    %cst_47 = arith.constant -0.00367342844 : f32
    %83 = vector.broadcast %cst_46 : f32 to vector<4x128xf32>
    %84 = vector.broadcast %cst_47 : f32 to vector<4x128xf32>
    %85 = arith.select %63, %83, %84 : vector<4x128xi1>, vector<4x128xf32>
    %86 = arith.mulf %82, %69 : vector<4x128xf32>
    %87 = arith.addf %85, %86 : vector<4x128xf32>
    %cst_48 = arith.constant 2.1858087E-4 : f32
    %cst_49 = arith.constant 0.00573950773 : f32
    %88 = vector.broadcast %cst_48 : f32 to vector<4x128xf32>
    %89 = vector.broadcast %cst_49 : f32 to vector<4x128xf32>
    %90 = arith.select %63, %88, %89 : vector<4x128xi1>, vector<4x128xf32>
    %91 = arith.mulf %87, %69 : vector<4x128xf32>
    %92 = arith.addf %90, %91 : vector<4x128xf32>
    %cst_50 = arith.constant -0.00125372503 : f32
    %cst_51 = arith.constant -0.0076224613 : f32
    %93 = vector.broadcast %cst_50 : f32 to vector<4x128xf32>
    %94 = vector.broadcast %cst_51 : f32 to vector<4x128xf32>
    %95 = arith.select %63, %93, %94 : vector<4x128xi1>, vector<4x128xf32>
    %96 = arith.mulf %92, %69 : vector<4x128xf32>
    %97 = arith.addf %95, %96 : vector<4x128xf32>
    %cst_52 = arith.constant -0.00417768164 : f32
    %cst_53 = arith.constant 0.00943887047 : f32
    %98 = vector.broadcast %cst_52 : f32 to vector<4x128xf32>
    %99 = vector.broadcast %cst_53 : f32 to vector<4x128xf32>
    %100 = arith.select %63, %98, %99 : vector<4x128xi1>, vector<4x128xf32>
    %101 = arith.mulf %97, %69 : vector<4x128xf32>
    %102 = arith.addf %100, %101 : vector<4x128xf32>
    %cst_54 = arith.constant 0.246640727 : f32
    %cst_55 = arith.constant 1.00167406 : f32
    %103 = vector.broadcast %cst_54 : f32 to vector<4x128xf32>
    %104 = vector.broadcast %cst_55 : f32 to vector<4x128xf32>
    %105 = arith.select %63, %103, %104 : vector<4x128xi1>, vector<4x128xf32>
    %106 = arith.mulf %102, %69 : vector<4x128xf32>
    %107 = arith.addf %105, %106 : vector<4x128xf32>
    %cst_56 = arith.constant 1.50140941 : f32
    %cst_57 = arith.constant 2.83297682 : f32
    %108 = vector.broadcast %cst_56 : f32 to vector<4x128xf32>
    %109 = vector.broadcast %cst_57 : f32 to vector<4x128xf32>
    %110 = arith.select %63, %108, %109 : vector<4x128xi1>, vector<4x128xf32>
    %111 = arith.mulf %107, %69 : vector<4x128xf32>
    %112 = arith.addf %110, %111 : vector<4x128xf32>
    %113 = math.absf %55 : vector<4x128xf32>
    %cst_58 = arith.constant 1.000000e+00 : f32
    %114 = vector.broadcast %cst_58 : f32 to vector<4x128xf32>
    %115 = arith.cmpf oeq, %113, %114 : vector<4x128xf32>
    %cst_59 = arith.constant 0x7F800000 : f32
    %116 = vector.broadcast %cst_59 : f32 to vector<4x128xf32>
    %117 = arith.mulf %116, %55 : vector<4x128xf32>
    %118 = arith.mulf %112, %55 : vector<4x128xf32>
    %119 = arith.select %115, %117, %118 : vector<4x128xi1>, vector<4x128xf32>
    %cst_60 = arith.constant 1.41421354 : f32
    %120 = vector.broadcast %cst_60 : f32 to vector<4x128xf32>
    %121 = arith.mulf %120, %119 : vector<4x128xf32>
    %122 = arith.mulf %121, %33 : vector<4x128xf32>
    %123 = arith.addf %122, %32 : vector<4x128xf32>
    %cst_61 = arith.constant 1.000000e+00 : f32
    %124 = vector.broadcast %cst_61 : f32 to vector<4x128xf32>
    %125 = arith.subf %124, %29 : vector<4x128xf32>
    %126 = arith.mulf %31, %29 : vector<4x128xf32>
    %127 = arith.mulf %125, %123 : vector<4x128xf32>
    %128 = arith.addf %126, %127 : vector<4x128xf32>
    %129 = vector.broadcast %34 : vector<4x1xf32> to vector<4x128xf32>
    %130 = arith.mulf %128, %129 : vector<4x128xf32>
    %131 = tpu.reciprocal %33 {approx = true} : vector<4x128xf32> -> vector<4x128xf32>
    %132 = arith.subf %31, %32 : vector<4x128xf32>
    %133 = arith.mulf %132, %131 : vector<4x128xf32>
    %134 = arith.mulf %125, %125 : vector<4x128xf32>
    %135 = arith.mulf %133, %29 : vector<4x128xf32>
    %136 = math.log %134 : vector<4x128xf32>
    %cst_62 = arith.constant 1.000000e+00 : f32
    %137 = vector.broadcast %cst_62 : f32 to vector<4x128xf32>
    %138 = arith.addf %137, %136 : vector<4x128xf32>
    %139 = arith.mulf %135, %135 : vector<4x128xf32>
    %140 = arith.subf %138, %139 : vector<4x128xf32>
    %141 = arith.subf %140, %134 : vector<4x128xf32>
    %cst_63 = arith.constant -5.000000e-01 : f32
    %142 = vector.broadcast %cst_63 : f32 to vector<4x128xf32>
    %143 = arith.mulf %142, %141 : vector<4x128xf32>
    %144 = vector.broadcast %34 : vector<4x1xf32> to vector<4x128xf32>
    %145 = arith.mulf %143, %144 : vector<4x128xf32>
    %c0_64 = arith.constant 0 : index
    %c0_65 = arith.constant 0 : index
    %c0_66 = arith.constant 0 : index
    %146 = vector.load %arg14[%c0_64, %c0_65, %c0_66] : memref<1x4x128xf32, #tpu.memory_space<vmem>>, vector<1x4x128xf32>
    %147 = vector.shape_cast %146 : vector<1x4x128xf32> to vector<4x128xf32>
    %148 = vector.shape_cast %130 : vector<4x128xf32> to vector<1x4x128xf32>
    tpu.vector_store %arg14[%c0_64, %c0_65, %c0_66], %148 {strides = array<i32>} : memref<1x4x128xf32, #tpu.memory_space<vmem>>, vector<1x4x128xf32>,
    %c0_67 = arith.constant 0 : index
    %c0_68 = arith.constant 0 : index
    %c0_69 = arith.constant 0 : index
    %149 = vector.load %arg15[%c0_67, %c0_68, %c0_69] : memref<1x4x128xf32, #tpu.memory_space<vmem>>, vector<1x4x128xf32>
    %150 = vector.shape_cast %149 : vector<1x4x128xf32> to vector<4x128xf32>
    %151 = vector.shape_cast %29 : vector<4x128xf32> to vector<1x4x128xf32>
    tpu.vector_store %arg15[%c0_67, %c0_68, %c0_69], %151 {strides = array<i32>} : memref<1x4x128xf32, #tpu.memory_space<vmem>>, vector<1x4x128xf32>,
    %c0_i32_70 = arith.constant 0 : i32
    %152 = arith.cmpi eq, %arg1, %c0_i32_70 : i32
    %153 = arith.extui %152 : i1 to i32
    %c0_i32_71 = arith.constant 0 : i32
    %154 = arith.cmpi ne, %153, %c0_i32_71 : i32
    scf.if %154 {
      %cst_77 = arith.constant 0.000000e+00 : f32
      %161 = vector.broadcast %cst_77 : f32 to vector<4x128xf32>
      %c0_78 = arith.constant 0 : index
      %c0_79 = arith.constant 0 : index
      %162 = vector.load %arg16[%c0_78, %c0_79] : memref<4x128xf32, #tpu.memory_space<vmem>>, vector<4x128xf32>
      tpu.vector_store %arg16[%c0_78, %c0_79], %161 {strides = array<i32>} : memref<4x128xf32, #tpu.memory_space<vmem>>, vector<4x128xf32>,
    } else {
    }
    %c0_72 = arith.constant 0 : index
    %c0_73 = arith.constant 0 : index
    %155 = vector.load %arg16[%c0_72, %c0_73] : memref<4x128xf32, #tpu.memory_space<vmem>>, vector<4x128xf32>
    %156 = arith.addf %155, %145 : vector<4x128xf32>
    %c0_74 = arith.constant 0 : index
    %c0_75 = arith.constant 0 : index
    %157 = vector.load %arg16[%c0_74, %c0_75] : memref<4x128xf32, #tpu.memory_space<vmem>>, vector<4x128xf32>
    tpu.vector_store %arg16[%c0_74, %c0_75], %156 {strides = array<i32>} : memref<4x128xf32, #tpu.memory_space<vmem>>, vector<4x128xf32>,
    %c1_i32 = arith.constant 1 : i32
    %158 = arith.cmpi eq, %arg1, %c1_i32 : i32
    %159 = arith.extui %158 : i1 to i32
    %c0_i32_76 = arith.constant 0 : i32
    %160 = arith.cmpi ne, %159, %c0_i32_76 : i32
    scf.if %160 {
      %c0_77 = arith.constant 0 : index
      %c0_78 = arith.constant 0 : index
      %161 = vector.load %arg16[%c0_77, %c0_78] : memref<4x128xf32, #tpu.memory_space<vmem>>, vector<4x128xf32>
      %cst_79 = arith.constant 5.000000e-01 : f32
      %162 = vector.broadcast %cst_79 : f32 to vector<4x128xf32>
      %163 = arith.mulf %161, %162 : vector<4x128xf32>
      %c0_80 = arith.constant 0 : index
      %c0_81 = arith.constant 0 : index
      %164 = vector.load %arg16[%c0_80, %c0_81] : memref<4x128xf32, #tpu.memory_space<vmem>>, vector<4x128xf32>
      tpu.vector_store %arg16[%c0_80, %c0_81], %163 {strides = array<i32>} : memref<4x128xf32, #tpu.memory_space<vmem>>, vector<4x128xf32>,
    } else {
    }
    return
  }
  func.func @transform_0(%arg0: i32, %arg1: i32, %arg2: memref<1xi32, #tpu.memory_space<smem>>) -> (i32, i32, i32) {
    %c0_i32 = arith.constant 0 : i32
    %c0_i32_0 = arith.constant 0 : i32
    return %arg1, %c0_i32, %arg0 : i32, i32, i32
  }
  func.func @transform_1(%arg0: i32, %arg1: i32, %arg2: memref<1xi32, #tpu.memory_space<smem>>) -> (i32, i32, i32) {
    %c0_i32 = arith.constant 0 : i32
    %c0_i32_0 = arith.constant 0 : i32
    return %arg1, %c0_i32, %arg0 : i32, i32, i32
  }
  func.func @transform_2(%arg0: i32, %arg1: i32, %arg2: memref<1xi32, #tpu.memory_space<smem>>) -> (i32, i32) {
    %c0_i32 = arith.constant 0 : i32
    %c0_i32_0 = arith.constant 0 : i32
    return %c0_i32, %arg0 : i32, i32
  }
  func.func @transform_3(%arg0: i32, %arg1: i32, %arg2: memref<1xi32, #tpu.memory_space<smem>>) -> (i32, i32) {
    %c0_i32 = arith.constant 0 : i32
    %c0_i32_0 = arith.constant 0 : i32
    return %c0_i32, %arg0 : i32, i32
  }
  func.func @transform_4(%arg0: i32, %arg1: i32, %arg2: memref<1xi32, #tpu.memory_space<smem>>) -> (i32, i32) {
    %c0_i32 = arith.constant 0 : i32
    %c0_i32_0 = arith.constant 0 : i32
    %c0_i32_1 = arith.constant 0 : i32
    return %c0_i32, %c0_i32_0 : i32, i32
  }
  func.func @transform_5(%arg0: i32, %arg1: i32, %arg2: memref<1xi32, #tpu.memory_space<smem>>) -> (i32, i32) {
    %c0_i32 = arith.constant 0 : i32
    %c0_i32_0 = arith.constant 0 : i32
    %c0_i32_1 = arith.constant 0 : i32
    return %c0_i32, %c0_i32_0 : i32, i32
  }
  func.func @transform_6(%arg0: i32, %arg1: i32, %arg2: memref<1xi32, #tpu.memory_space<smem>>) -> (i32, i32) {
    %c0_i32 = arith.constant 0 : i32
    %c0_i32_0 = arith.constant 0 : i32
    %c0_i32_1 = arith.constant 0 : i32
    return %c0_i32, %c0_i32_0 : i32, i32
  }
  func.func @transform_7(%arg0: i32, %arg1: i32, %arg2: memref<1xi32, #tpu.memory_space<smem>>) -> (i32, i32) {
    %c0_i32 = arith.constant 0 : i32
    %c0_i32_0 = arith.constant 0 : i32
    %c0_i32_1 = arith.constant 0 : i32
    return %c0_i32, %c0_i32_0 : i32, i32
  }
  func.func @transform_8(%arg0: i32, %arg1: i32, %arg2: memref<1xi32, #tpu.memory_space<smem>>) -> (i32, i32) {
    %c0_i32 = arith.constant 0 : i32
    %c0_i32_0 = arith.constant 0 : i32
    %c0_i32_1 = arith.constant 0 : i32
    return %c0_i32, %c0_i32_0 : i32, i32
  }
  func.func @transform_9(%arg0: i32, %arg1: i32, %arg2: memref<1xi32, #tpu.memory_space<smem>>) -> (i32, i32) {
    %c0_i32 = arith.constant 0 : i32
    %c0_i32_0 = arith.constant 0 : i32
    %c0_i32_1 = arith.constant 0 : i32
    return %c0_i32, %c0_i32_0 : i32, i32
  }
  func.func @transform_10(%arg0: i32, %arg1: i32, %arg2: memref<1xi32, #tpu.memory_space<smem>>) -> (i32, i32) {
    %c0_i32 = arith.constant 0 : i32
    %c0_i32_0 = arith.constant 0 : i32
    %c0_i32_1 = arith.constant 0 : i32
    return %c0_i32, %c0_i32_0 : i32, i32
  }
  func.func @transform_11(%arg0: i32, %arg1: i32, %arg2: memref<1xi32, #tpu.memory_space<smem>>) -> (i32, i32, i32) {
    %c0_i32 = arith.constant 0 : i32
    %c0_i32_0 = arith.constant 0 : i32
    return %arg1, %c0_i32, %arg0 : i32, i32, i32
  }
  func.func @transform_12(%arg0: i32, %arg1: i32, %arg2: memref<1xi32, #tpu.memory_space<smem>>) -> (i32, i32, i32) {
    %c0_i32 = arith.constant 0 : i32
    %c0_i32_0 = arith.constant 0 : i32
    return %arg1, %c0_i32, %arg0 : i32, i32, i32
  }
  func.func @transform_13(%arg0: i32, %arg1: i32, %arg2: memref<1xi32, #tpu.memory_space<smem>>) -> (i32, i32) {
    %c0_i32 = arith.constant 0 : i32
    %c0_i32_0 = arith.constant 0 : i32
    return %c0_i32, %arg0 : i32, i32
  }
}

module attributes {stable_mosaic.version = 11 : i64} {
  func.func @kernel(%arg0: i32, %arg1: i32, %arg2: memref<1x8x128xf32, #tpu.memory_space<vmem>>, %arg3: memref<1x4x128xf32, #tpu.memory_space<vmem>>, %arg4: memref<1x4x128xf32, #tpu.memory_space<vmem>>, %arg5: memref<4x128xf32, #tpu.memory_space<vmem>>, %arg6: memref<4x128xf32, #tpu.memory_space<vmem>>, %arg7: memref<4x1xf32, #tpu.memory_space<vmem>>, %arg8: memref<4x8xf32, #tpu.memory_space<vmem>>, %arg9: memref<4x1xf32, #tpu.memory_space<vmem>>, %arg10: memref<8x4xf32, #tpu.memory_space<vmem>>, %arg11: memref<8x1xf32, #tpu.memory_space<vmem>>, %arg12: memref<4x8xf32, #tpu.memory_space<vmem>>, %arg13: memref<4x1xf32, #tpu.memory_space<vmem>>, %arg14: memref<1x4x128xf32, #tpu.memory_space<vmem>>, %arg15: memref<1x4x128xf32, #tpu.memory_space<vmem>>, %arg16: memref<4x128xf32, #tpu.memory_space<vmem>>) attributes {dimension_semantics = [#tpu.dimension_semantics<parallel>, #tpu.dimension_semantics<arbitrary>], iteration_bounds = array<i64: 2, 2>, scalar_prefetch = 0 : i64, scratch_operands = 0 : i64, tpu.core_type = #tpu.core_type<tc>, window_params = [{transform_indices = @transform_0, window_bounds = array<i64: 1, 8, 128>}, {transform_indices = @transform_1, window_bounds = array<i64: 1, 4, 128>}, {transform_indices = @transform_2, window_bounds = array<i64: 1, 4, 128>}, {transform_indices = @transform_3, window_bounds = array<i64: 4, 128>}, {transform_indices = @transform_4, window_bounds = array<i64: 4, 128>}, {pipeline_mode = #tpu.pipeline_mode<synchronous>, transform_indices = @transform_5, window_bounds = array<i64: 4, 1>}, {pipeline_mode = #tpu.pipeline_mode<synchronous>, transform_indices = @transform_6, window_bounds = array<i64: 4, 8>}, {pipeline_mode = #tpu.pipeline_mode<synchronous>, transform_indices = @transform_7, window_bounds = array<i64: 4, 1>}, {pipeline_mode = #tpu.pipeline_mode<synchronous>, transform_indices = @transform_8, window_bounds = array<i64: 8, 4>}, {pipeline_mode = #tpu.pipeline_mode<synchronous>, transform_indices = @transform_9, window_bounds = array<i64: 8, 1>}, {pipeline_mode = #tpu.pipeline_mode<synchronous>, transform_indices = @transform_10, window_bounds = array<i64: 4, 8>}, {pipeline_mode = #tpu.pipeline_mode<synchronous>, transform_indices = @transform_11, window_bounds = array<i64: 4, 1>}, {transform_indices = @transform_12, window_bounds = array<i64: 1, 4, 128>}, {transform_indices = @transform_13, window_bounds = array<i64: 1, 4, 128>}, {transform_indices = @transform_14, window_bounds = array<i64: 4, 128>}]} {
    %c0 = arith.constant 0 : index
    %c0_0 = arith.constant 0 : index
    %c0_1 = arith.constant 0 : index
    %0 = vector.load %arg2[%c0, %c0_0, %c0_1] : memref<1x8x128xf32, #tpu.memory_space<vmem>>, vector<1x8x128xf32>
    %1 = vector.shape_cast %0 : vector<1x8x128xf32> to vector<8x128xf32>
    %c0_2 = arith.constant 0 : index
    %c0_3 = arith.constant 0 : index
    %2 = vector.load %arg8[%c0_2, %c0_3] : memref<4x8xf32, #tpu.memory_space<vmem>>, vector<4x8xf32>
    %cst = arith.constant dense<0.000000e+00> : vector<4x128xf32>
    %3 = tpu.matmul %2, %1, %cst {dimension_numbers = #tpu.dot_dimension_numbers<[1], [0], [0], [1], [0, 0, 1, 1], [], []>} : vector<4x8xf32>, vector<8x128xf32>, vector<4x128xf32> -> vector<4x128xf32>
    %c0_4 = arith.constant 0 : index
    %c0_5 = arith.constant 0 : index
    %4 = vector.load %arg9[%c0_4, %c0_5] : memref<4x1xf32, #tpu.memory_space<vmem>>, vector<4x1xf32>
    %5 = vector.broadcast %4 : vector<4x1xf32> to vector<4x128xf32>
    %6 = arith.addf %3, %5 : vector<4x128xf32>
    %cst_6 = arith.constant 0.000000e+00 : f32
    %7 = vector.broadcast %cst_6 : f32 to vector<4x128xf32>
    %8 = arith.maximumf %6, %7 : vector<4x128xf32>
    %c0_7 = arith.constant 0 : index
    %c0_8 = arith.constant 0 : index
    %9 = vector.load %arg10[%c0_7, %c0_8] : memref<8x4xf32, #tpu.memory_space<vmem>>, vector<8x4xf32>
    %cst_9 = arith.constant dense<0.000000e+00> : vector<8x128xf32>
    %10 = tpu.matmul %9, %8, %cst_9 {dimension_numbers = #tpu.dot_dimension_numbers<[1], [0], [0], [1], [0, 0, 1, 1], [], []>} : vector<8x4xf32>, vector<4x128xf32>, vector<8x128xf32> -> vector<8x128xf32>
    %c0_10 = arith.constant 0 : index
    %c0_11 = arith.constant 0 : index
    %11 = vector.load %arg11[%c0_10, %c0_11] : memref<8x1xf32, #tpu.memory_space<vmem>>, vector<8x1xf32>
    %12 = vector.broadcast %11 : vector<8x1xf32> to vector<8x128xf32>
    %13 = arith.addf %10, %12 : vector<8x128xf32>
    %cst_12 = arith.constant 0.000000e+00 : f32
    %14 = vector.broadcast %cst_12 : f32 to vector<8x128xf32>
    %15 = arith.maximumf %13, %14 : vector<8x128xf32>
    %c0_13 = arith.constant 0 : index
    %c0_14 = arith.constant 0 : index
    %16 = vector.load %arg12[%c0_13, %c0_14] : memref<4x8xf32, #tpu.memory_space<vmem>>, vector<4x8xf32>
    %cst_15 = arith.constant dense<0.000000e+00> : vector<4x128xf32>
    %17 = tpu.matmul %16, %15, %cst_15 {dimension_numbers = #tpu.dot_dimension_numbers<[1], [0], [0], [1], [0, 0, 1, 1], [], []>} : vector<4x8xf32>, vector<8x128xf32>, vector<4x128xf32> -> vector<4x128xf32>
    %c0_16 = arith.constant 0 : index
    %c0_17 = arith.constant 0 : index
    %18 = vector.load %arg13[%c0_16, %c0_17] : memref<4x1xf32, #tpu.memory_space<vmem>>, vector<4x1xf32>
    %19 = vector.broadcast %18 : vector<4x1xf32> to vector<4x128xf32>
    %20 = arith.addf %17, %19 : vector<4x128xf32>
    %cst_18 = arith.constant -5.000000e+00 : f32
    %cst_19 = arith.constant 5.000000e+00 : f32
    %21 = vector.broadcast %cst_18 : f32 to vector<4x128xf32>
    %22 = arith.maximumf %21, %20 : vector<4x128xf32>
    %23 = vector.broadcast %cst_19 : f32 to vector<4x128xf32>
    %24 = arith.minimumf %23, %22 : vector<4x128xf32>
    %25 = arith.negf %24 : vector<4x128xf32>
    %26 = math.exp %25 : vector<4x128xf32>
    %cst_20 = arith.constant 1.000000e+00 : f32
    %27 = vector.broadcast %cst_20 : f32 to vector<4x128xf32>
    %28 = arith.addf %27, %26 : vector<4x128xf32>
    %29 = arith.divf %27, %28 : vector<4x128xf32>
    %c0_21 = arith.constant 0 : index
    %c0_22 = arith.constant 0 : index
    %c0_23 = arith.constant 0 : index
    %30 = vector.load %arg3[%c0_21, %c0_22, %c0_23] : memref<1x4x128xf32, #tpu.memory_space<vmem>>, vector<1x4x128xf32>
    %31 = vector.shape_cast %30 : vector<1x4x128xf32> to vector<4x128xf32>
    %c0_24 = arith.constant 0 : index
    %c0_25 = arith.constant 0 : index
    %32 = vector.load %arg5[%c0_24, %c0_25] : memref<4x128xf32, #tpu.memory_space<vmem>>, vector<4x128xf32>
    %c0_26 = arith.constant 0 : index
    %c0_27 = arith.constant 0 : index
    %33 = vector.load %arg6[%c0_26, %c0_27] : memref<4x128xf32, #tpu.memory_space<vmem>>, vector<4x128xf32>
    %c0_28 = arith.constant 0 : index
    %c0_29 = arith.constant 0 : index
    %34 = vector.load %arg7[%c0_28, %c0_29] : memref<4x1xf32, #tpu.memory_space<vmem>>, vector<4x1xf32>
    %c0_30 = arith.constant 0 : index
    %c0_31 = arith.constant 0 : index
    %c0_32 = arith.constant 0 : index
    %35 = vector.load %arg4[%c0_30, %c0_31, %c0_32] : memref<1x4x128xf32, #tpu.memory_space<vmem>>, vector<1x4x128xf32>
    %36 = vector.shape_cast %35 : vector<1x4x128xf32> to vector<4x128xf32>
    %37 = arith.mulf %36, %33 : vector<4x128xf32>
    %38 = arith.addf %37, %32 : vector<4x128xf32>
    %cst_33 = arith.constant 1.000000e+00 : f32
    %39 = vector.broadcast %cst_33 : f32 to vector<4x128xf32>
    %40 = arith.subf %39, %29 : vector<4x128xf32>
    %41 = arith.mulf %31, %29 : vector<4x128xf32>
    %42 = arith.mulf %40, %38 : vector<4x128xf32>
    %43 = arith.addf %41, %42 : vector<4x128xf32>
    %44 = vector.broadcast %34 : vector<4x1xf32> to vector<4x128xf32>
    %45 = arith.mulf %43, %44 : vector<4x128xf32>
    %46 = tpu.reciprocal %33 {approx = true} : vector<4x128xf32> -> vector<4x128xf32>
    %47 = arith.subf %31, %32 : vector<4x128xf32>
    %48 = arith.mulf %47, %46 : vector<4x128xf32>
    %49 = arith.mulf %40, %40 : vector<4x128xf32>
    %50 = arith.mulf %48, %29 : vector<4x128xf32>
    %51 = math.log %49 : vector<4x128xf32>
    %cst_34 = arith.constant 1.000000e+00 : f32
    %52 = vector.broadcast %cst_34 : f32 to vector<4x128xf32>
    %53 = arith.addf %52, %51 : vector<4x128xf32>
    %54 = arith.mulf %50, %50 : vector<4x128xf32>
    %55 = arith.subf %53, %54 : vector<4x128xf32>
    %56 = arith.subf %55, %49 : vector<4x128xf32>
    %cst_35 = arith.constant -5.000000e-01 : f32
    %57 = vector.broadcast %cst_35 : f32 to vector<4x128xf32>
    %58 = arith.mulf %57, %56 : vector<4x128xf32>
    %59 = vector.broadcast %34 : vector<4x1xf32> to vector<4x128xf32>
    %60 = arith.mulf %58, %59 : vector<4x128xf32>
    %c0_36 = arith.constant 0 : index
    %c0_37 = arith.constant 0 : index
    %c0_38 = arith.constant 0 : index
    %61 = vector.load %arg14[%c0_36, %c0_37, %c0_38] : memref<1x4x128xf32, #tpu.memory_space<vmem>>, vector<1x4x128xf32>
    %62 = vector.shape_cast %61 : vector<1x4x128xf32> to vector<4x128xf32>
    %63 = vector.shape_cast %45 : vector<4x128xf32> to vector<1x4x128xf32>
    tpu.vector_store %arg14[%c0_36, %c0_37, %c0_38], %63 {strides = array<i32>} : memref<1x4x128xf32, #tpu.memory_space<vmem>>, vector<1x4x128xf32>,
    %c0_39 = arith.constant 0 : index
    %c0_40 = arith.constant 0 : index
    %c0_41 = arith.constant 0 : index
    %64 = vector.load %arg15[%c0_39, %c0_40, %c0_41] : memref<1x4x128xf32, #tpu.memory_space<vmem>>, vector<1x4x128xf32>
    %65 = vector.shape_cast %64 : vector<1x4x128xf32> to vector<4x128xf32>
    %66 = vector.shape_cast %29 : vector<4x128xf32> to vector<1x4x128xf32>
    tpu.vector_store %arg15[%c0_39, %c0_40, %c0_41], %66 {strides = array<i32>} : memref<1x4x128xf32, #tpu.memory_space<vmem>>, vector<1x4x128xf32>,
    %c0_i32 = arith.constant 0 : i32
    %67 = arith.cmpi eq, %arg1, %c0_i32 : i32
    %68 = arith.extui %67 : i1 to i32
    %c0_i32_42 = arith.constant 0 : i32
    %69 = arith.cmpi ne, %68, %c0_i32_42 : i32
    scf.if %69 {
      %cst_48 = arith.constant 0.000000e+00 : f32
      %76 = vector.broadcast %cst_48 : f32 to vector<4x128xf32>
      %c0_49 = arith.constant 0 : index
      %c0_50 = arith.constant 0 : index
      %77 = vector.load %arg16[%c0_49, %c0_50] : memref<4x128xf32, #tpu.memory_space<vmem>>, vector<4x128xf32>
      tpu.vector_store %arg16[%c0_49, %c0_50], %76 {strides = array<i32>} : memref<4x128xf32, #tpu.memory_space<vmem>>, vector<4x128xf32>,
    } else {
    }
    %c0_43 = arith.constant 0 : index
    %c0_44 = arith.constant 0 : index
    %70 = vector.load %arg16[%c0_43, %c0_44] : memref<4x128xf32, #tpu.memory_space<vmem>>, vector<4x128xf32>
    %71 = arith.addf %70, %60 : vector<4x128xf32>
    %c0_45 = arith.constant 0 : index
    %c0_46 = arith.constant 0 : index
    %72 = vector.load %arg16[%c0_45, %c0_46] : memref<4x128xf32, #tpu.memory_space<vmem>>, vector<4x128xf32>
    tpu.vector_store %arg16[%c0_45, %c0_46], %71 {strides = array<i32>} : memref<4x128xf32, #tpu.memory_space<vmem>>, vector<4x128xf32>,
    %c1_i32 = arith.constant 1 : i32
    %73 = arith.cmpi eq, %arg1, %c1_i32 : i32
    %74 = arith.extui %73 : i1 to i32
    %c0_i32_47 = arith.constant 0 : i32
    %75 = arith.cmpi ne, %74, %c0_i32_47 : i32
    scf.if %75 {
      %c0_48 = arith.constant 0 : index
      %c0_49 = arith.constant 0 : index
      %76 = vector.load %arg16[%c0_48, %c0_49] : memref<4x128xf32, #tpu.memory_space<vmem>>, vector<4x128xf32>
      %cst_50 = arith.constant 5.000000e-01 : f32
      %77 = vector.broadcast %cst_50 : f32 to vector<4x128xf32>
      %78 = arith.mulf %76, %77 : vector<4x128xf32>
      %c0_51 = arith.constant 0 : index
      %c0_52 = arith.constant 0 : index
      %79 = vector.load %arg16[%c0_51, %c0_52] : memref<4x128xf32, #tpu.memory_space<vmem>>, vector<4x128xf32>
      tpu.vector_store %arg16[%c0_51, %c0_52], %78 {strides = array<i32>} : memref<4x128xf32, #tpu.memory_space<vmem>>, vector<4x128xf32>,
    } else {
    }
    return
  }
  func.func @transform_0(%arg0: i32, %arg1: i32) -> (i32, i32, i32) {
    %c0_i32 = arith.constant 0 : i32
    %c0_i32_0 = arith.constant 0 : i32
    return %arg1, %c0_i32, %arg0 : i32, i32, i32
  }
  func.func @transform_1(%arg0: i32, %arg1: i32) -> (i32, i32, i32) {
    %c0_i32 = arith.constant 0 : i32
    %c0_i32_0 = arith.constant 0 : i32
    return %arg1, %c0_i32, %arg0 : i32, i32, i32
  }
  func.func @transform_2(%arg0: i32, %arg1: i32) -> (i32, i32, i32) {
    %c0_i32 = arith.constant 0 : i32
    %c0_i32_0 = arith.constant 0 : i32
    return %arg1, %c0_i32, %arg0 : i32, i32, i32
  }
  func.func @transform_3(%arg0: i32, %arg1: i32) -> (i32, i32) {
    %c0_i32 = arith.constant 0 : i32
    %c0_i32_0 = arith.constant 0 : i32
    return %c0_i32, %arg0 : i32, i32
  }
  func.func @transform_4(%arg0: i32, %arg1: i32) -> (i32, i32) {
    %c0_i32 = arith.constant 0 : i32
    %c0_i32_0 = arith.constant 0 : i32
    return %c0_i32, %arg0 : i32, i32
  }
  func.func @transform_5(%arg0: i32, %arg1: i32) -> (i32, i32) {
    %c0_i32 = arith.constant 0 : i32
    %c0_i32_0 = arith.constant 0 : i32
    %c0_i32_1 = arith.constant 0 : i32
    return %c0_i32, %c0_i32_0 : i32, i32
  }
  func.func @transform_6(%arg0: i32, %arg1: i32) -> (i32, i32) {
    %c0_i32 = arith.constant 0 : i32
    %c0_i32_0 = arith.constant 0 : i32
    %c0_i32_1 = arith.constant 0 : i32
    return %c0_i32, %c0_i32_0 : i32, i32
  }
  func.func @transform_7(%arg0: i32, %arg1: i32) -> (i32, i32) {
    %c0_i32 = arith.constant 0 : i32
    %c0_i32_0 = arith.constant 0 : i32
    %c0_i32_1 = arith.constant 0 : i32
    return %c0_i32, %c0_i32_0 : i32, i32
  }
  func.func @transform_8(%arg0: i32, %arg1: i32) -> (i32, i32) {
    %c0_i32 = arith.constant 0 : i32
    %c0_i32_0 = arith.constant 0 : i32
    %c0_i32_1 = arith.constant 0 : i32
    return %c0_i32, %c0_i32_0 : i32, i32
  }
  func.func @transform_9(%arg0: i32, %arg1: i32) -> (i32, i32) {
    %c0_i32 = arith.constant 0 : i32
    %c0_i32_0 = arith.constant 0 : i32
    %c0_i32_1 = arith.constant 0 : i32
    return %c0_i32, %c0_i32_0 : i32, i32
  }
  func.func @transform_10(%arg0: i32, %arg1: i32) -> (i32, i32) {
    %c0_i32 = arith.constant 0 : i32
    %c0_i32_0 = arith.constant 0 : i32
    %c0_i32_1 = arith.constant 0 : i32
    return %c0_i32, %c0_i32_0 : i32, i32
  }
  func.func @transform_11(%arg0: i32, %arg1: i32) -> (i32, i32) {
    %c0_i32 = arith.constant 0 : i32
    %c0_i32_0 = arith.constant 0 : i32
    %c0_i32_1 = arith.constant 0 : i32
    return %c0_i32, %c0_i32_0 : i32, i32
  }
  func.func @transform_12(%arg0: i32, %arg1: i32) -> (i32, i32, i32) {
    %c0_i32 = arith.constant 0 : i32
    %c0_i32_0 = arith.constant 0 : i32
    return %arg1, %c0_i32, %arg0 : i32, i32, i32
  }
  func.func @transform_13(%arg0: i32, %arg1: i32) -> (i32, i32, i32) {
    %c0_i32 = arith.constant 0 : i32
    %c0_i32_0 = arith.constant 0 : i32
    return %arg1, %c0_i32, %arg0 : i32, i32, i32
  }
  func.func @transform_14(%arg0: i32, %arg1: i32) -> (i32, i32) {
    %c0_i32 = arith.constant 0 : i32
    %c0_i32_0 = arith.constant 0 : i32
    return %c0_i32, %arg0 : i32, i32
  }
}

</mosaic_0001>

<bundles_post_ra>
// kernel: tpu_custom_call.1
= control target key start
LH: loop header
LB: loop body
LE: loop exit
PB: predicated region body
PF: predicated region fallthrough
CT: control target
= control target key end

     0   :  { %s2363_s0 = inlined_call_operand.<no memory space> [shape: s32[1], index: 0, kind: input, shape index: {}]   ;;  %s2364_s1 = inlined_call_operand.vmem [shape: f32[2,8,256], index: 1, kind: input, shape index: {}]   ;;  %s2365_s2 = inlined_call_operand.hbm [shape: f32[2,4,256], index: 2, kind: input, shape index: {}]   ;;  %s2366_s3 = inlined_call_operand.vmem [shape: f32[4,256], index: 3, kind: input, shape index: {}]   ;;  %s2367_s4 = inlined_call_operand.hbm [shape: f32[4,256], index: 4, kind: input, shape index: {}]   ;;  %s2368_s5 = inlined_call_operand.vmem [shape: f32[4,1], index: 5, kind: input, shape index: {}]   ;;  %s2369_s6 = inlined_call_operand.hbm [shape: f32[4,8], index: 6, kind: input, shape index: {}]   ;;  %s2370_s7 = inlined_call_operand.vmem [shape: f32[4,1], index: 7, kind: input, shape index: {}]   ;;  %s2371_s8 = inlined_call_operand.vmem [shape: f32[8,4], index: 8, kind: input, shape index: {}]   ;;  %s2372_s9 = inlined_call_operand.vmem [shape: f32[8,1], index: 9, kind: input, shape index: {}]   ;;  %s2373_s10 = inlined_call_operand.vmem [shape: f32[4,8], index: 10, kind: input, shape index: {}]   ;;  %s2374_s11 = inlined_call_operand.vmem [shape: f32[4,1], index: 11, kind: input, shape index: {}]   ;;  %s2375_s12 = inlined_call_operand.hbm [shape: f32[2,4,256], index: 12, kind: output, shape index: {0}]   ;;  %s2376_s13 = inlined_call_operand.hbm [shape: f32[2,4,256], index: 13, kind: output, shape index: {1}]   ;;  %s2377_s14 = inlined_call_operand.hbm [shape: f32[4,256], index: 14, kind: output, shape index: {2}]  }
   0x1   :  { %2397 = sst [smem:[#allocation27_spill]] %s2364_s1 }
   0x2   :  { %2398 = sst [smem:[#allocation28_spill]] %s2365_s2 }
   0x3   :  { %2399 = sst [smem:[#allocation29_spill]] %s2366_s3 }
   0x4   :  { %2400 = sst [smem:[#allocation30_spill]] %s2367_s4 }
   0x5   :  { %2401 = sst [smem:[#allocation31_spill]] %s2368_s5 }
   0x6   :  { %2402 = sst [smem:[#allocation32_spill]] %s2369_s6 }
   0x7   :  { %2403 = sst [smem:[#allocation33_spill]] %s2370_s7 }
   0x8   :  { %2404 = sst [smem:[#allocation34_spill]] %s2371_s8 }
   0x9   :  { %2405 = sst [smem:[#allocation35_spill]] %s2372_s9 }
   0xa   :  { %2406 = sst [smem:[#allocation36_spill]] %s2373_s10 }
   0xb   :  { %2407 = sst [smem:[#allocation37_spill]] %s2374_s11 }
   0xc   :  { %2408 = sst [smem:[#allocation38_spill]] %s2375_s12 }
   0xd   :  { %2409 = sst [smem:[#allocation39_spill]] %s2376_s13 }
   0xe   :  { %2410 = sst [smem:[#allocation40_spill]] %s2377_s14 }
   0xf   :  { %20 = sst [smem:[#allocation3]] %s2363_s0 }
  0x10   :  { %21 = vsyncpa [#allocation5], 0 }
  0x11   :  { %23 = vsyncpa [#allocation5 + $0x1], 0 }
  0x12   :  { %24 = vsyncpa [#allocation8], 0 }
  0x13   :  { %26 = vsyncpa [#allocation8 + $0x1], 0 }
  0x14   :  { %27 = vsyncpa [#allocation6], 0 }
  0x15   :  { %29 = vsyncpa [#allocation6 + $0x1], 0 }
  0x16   :  { %30 = vsyncpa [#allocation12], 0 }
  0x17   :  { %32 = vsyncpa [#allocation12 + $0x1], 0  ;;  %s1935_s15 = smov 0   ;;  %s1937_s16 = smov 0  }
  0x18   :  { %s1939_s17 = smov 0   ;;  %s1941_s18 = smov 0  }
  0x19   :  { %s1943_s19 = smov 0   ;;  %s1945_s20 = smov 0  }
  0x1a   :  { %s1947_s0 = smov 0   ;;  %s1949_s21 = smov 0  }
  0x1b   :  { %s1951_s22 = smov 0   ;;  %s1953_s23 = smov 0  }
  0x1c   :  { %s1955_s24 = smov 0  }
  0x1d LB: > { %2411 = sst [smem:[#allocation20_spill]] %s1808_s18  ;;  %s1989_s25 = sadd.s32 4294967295, %s1836_s24   ;;  %s1836_s24 = sphi %s1955_s24, %s38_s24   ;;  %s1832_s23 = sphi %s1953_s23, %s2474_s23   ;;  %s1828_s22 = sphi %s1951_s22, %s2473_s22   ;;  %s1824_s21 = sphi %s1949_s21, %s2472_s21   ;;  %s1820_s0 = sphi %s1947_s0, %s2471_s0   ;;  %s1816_s20 = sphi %s1945_s20, %s2470_s20   ;;  %s1812_s19 = sphi %s1943_s19, %s2469_s19   ;;  %s1808_s18 = sphi %s1941_s18, %s2468_s18   ;;  %s1804_s17 = sphi %s1939_s17, %s2467_s17   ;;  %s1800_s16 = sphi %s1937_s16, %s2466_s16   ;;  %s1796_s15 = sphi %s1935_s15, %s2465_s15  }
  0x1e   : > { %2412 = sst [smem:[#allocation21_spill]] %s1824_s21  ;;  %s2378_s26 = sadd.s32 4294967294, %s1836_s24  }
  0x1f   : > { %p100_p0 = scmp.ne.s32.totalorder %s1812_s19, %s1808_s18  ;;  %p2392_p1 = scmp.eq.s32.totalorder %s1989_s25, 0 }
  0x20   : > { %p152_p2 = scmp.ne.s32.totalorder %s1800_s16, %s1796_s15  ;;  %p331_p5 = scmp.eq.s32.totalorder %s2378_s26, 3 }
  0x21   : > { %p1999_p4 = por %p2392_p1, %p100_p0  ;;  %p1350_p7 = scmp.ge.s32.totalorder %s1836_s24, 1 }
  0x22   : > { %p2007_p6 = por %p152_p2, %p2392_p1  ;;  %p2012_p8 = por %p331_p5, %p100_p0 }
  0x23   : > { %p2016_p9 = por %p331_p5, %p152_p2  ;;  %p392_p10 = scmp.lt.s32.totalorder %s1836_s24, 5 }
  0x24   : > { %s2414_s28 = scalar_select %p2007_p6, 1, 0 }
  0x25   : > { %s2415_s29 = scalar_select %p2012_p8, 1, 0 }
  0x26   : > { %s2417_s30 = scalar_select %p2016_p9, 1, 0 }
  0x27   : > { %2416 = sst [smem:[#allocation22_spill]] %s2415_s29  ;;  %p2021_p11 = pnand %p1350_p7, %p392_p10 }
  0x28   : > { %2418 = sst [smem:[#allocation23_spill]] %s2417_s30  ;;  %s1838_s26 = smov [#allocation9]  }
  0x29   : > { %s408_s18 = sshll.u32 %s1838_s26, 4  ;;  %p1425_p12 = pneg %p2021_p11  ;;  %s409_s18 = int_to_ptr.vmem [resolvable:$true] %s408_s18 }
  0x2a   : > { %s47_s14 = sadd.s32 1, %s1828_s22  ;;  %s1577_s30 = scalar_lea.vmem %s409_s18, 64 }
  0x2b   : > { %p1426_p13 = pnand %p1425_p12, %p2392_p1  ;;  %p2030_p0 = scmp.ge.s32.totalorder %s47_s14, 2 }
  0x2c   : > { %p1578_p5 = scmp.ne.s32.totalorder %s409_s18, %s1577_s30  ;;  %p1585_p3 = scmp.lt.s32.totalorder %s409_s18, %s409_s18 }
  0x2d   : > { %p1568_p2 = pneg %p1426_p13  ;;  %p1586_p9 = scmp.lt.s32.totalorder %s1577_s30, %s1577_s30 }
  0x2f   : > { %p1580_p7 = pnand %p1578_p5, %p1568_p2  ;;  %p1587_p8 = por %p1586_p9, %p1585_p3 }
  0x31   : > { %p1581_p10 = pneg %p1580_p7 }
  0x33   : > { %p1588_p6 = pnand %p1587_p8, %p1581_p10 }
  0x35   : > { %1591 = shalt.err (!%p1588_p6)
}
  0x36   : > { %s2421_s6 = sld [smem:[#allocation32_spill]]  ;;  %s2476_s14 = smov (%p2030_p0, %s47_s14), 0 }
  0x37   : > { %2422 = sst [smem:[#allocation24_spill]] %s2476_s14  ;;  %s50_s12 = sadd.s32 1, %s1832_s23 }
  0x38   : > { %s87_s30 = sadd.s32 1, %s1816_s20  ;;  %s2478_s12 = smov (!%p2030_p0, %s50_s12), %s1832_s23 }
  0x39   : > { %s82_s26 = ssub.s32 %s1828_s22, %s2476_s14  ;;  %p94_p3 = scmp.ne.s32.totalorder %s1816_s20, %s1812_s19 }
  0x3a   : > { %p52_p6 = scmp.ge.s32.totalorder %s2478_s12, 2  ;;  %p2393_p8 = scmp.eq.s32.totalorder %s1836_s24, 0 }
  0x3b   : > { %p2423_p9 = scmp.eq.s32.totalorder %s1989_s25, 3  ;;  %s445_s29 = sand.u32 1, %s1816_s20  }
  0x3c   : > { %1428 = dma.hbm_to_vmem [thread:$0]  (!%p1426_p13), %s2421_s6, 64, %s409_s18, [#allocation8]  }
  0x3d   : > { %p2053_p12 = por %p2423_p9, %p94_p3  ;;  %p1447_p13 = scmp.lt.s32.totalorder %s1836_s24, 4 }
  0x3e   : > { %s2480_s12 = smov (%p52_p6, %s2478_s12), 0  ;;  %p2062_p2 = por %p2393_p8, %p94_p3 }
  0x3f   : > { %s2424_s13 = scalar_select %p2053_p12, 1, 0 }
  0x40   : > { %2426 = sst [smem:[#allocation26_spill]] %s2480_s12  ;;  %s2069_s6 = ssub.s32 %s1832_s23, %s2480_s12 }
  0x41   : > { %2425 = sst [smem:[#allocation25_spill]] %s2424_s13  ;;  %s84_s14 = sor.u32 %s2069_s6, %s82_s26 }
  0x42   : > { %p137_p0 = scmp.eq.s32.totalorder %s2069_s6, 0  ;;  %p85_p5 = scmp.eq.s32.totalorder %s84_s14, 0 }
  0x43   : > { %s1353_s13 = sshll.u32 %s445_s29, 2  ;;  %s1354_s3 = sshll.u32 %s1828_s22, 1 }
  0x44   : > { %s2075_s10 = scalar_select %p85_p5, %s1816_s20, %s87_s30  }
  0x45   : > { %s454_s5 = sadd.s32 %s1832_s23, %s1354_s3  ;;  %s449_s11 = scalar_lea.vmem [#allocation4], %s1353_s13 }
  0x46   : > { %s458_s8 = sshll.u32 %s449_s11, 4  ;;  %s1355_s9 = sshll.u32 %s454_s5, 6  ;;  %s459_s8 = int_to_ptr.vmem [resolvable:$true] %s458_s8 }
  0x47   : > { %s2428_s2 = sld [smem:[#allocation28_spill]]  ;;  %p2085_p7 = pnand %p1447_p13, %p2062_p2 }
  0x48   : > { %s472_s14 = sand.u32 1, %s1836_s24   ;;  %s446_s26 = scalar_lea.sflag [#allocation5], %s445_s29 }
  0x49   : > { %p1594_p10 = pneg %p2085_p7  ;;  %s1605_s3 = scalar_lea.vmem %s459_s8, 64 }
  0x4a   : > { %p1606_p3 = scmp.ne.s32.totalorder %s459_s8, %s1605_s3  ;;  %s1839_s5 = smov [#allocation4]  }
  0x4b   : > { %s1610_s11 = sshll.u32 %s1839_s5, 4  ;;  %s1611_s11 = int_to_ptr.vmem [resolvable:$false] %s1610_s11 }
  0x4c   : > { %p1608_p6 = pnand %p1606_p3, %p1594_p10  ;;  %s1612_s1 = scalar_lea.vmem %s1611_s11, 128 }
  0x4d   : > { %s456_s21 = scalar_lea.hbm %s2428_s2, %s1355_s9  ;;  %p1613_p5 = scmp.lt.s32.totalorder %s459_s8, %s1611_s11 }
  0x4e   : > { %p1609_p9 = pneg %p1608_p6  ;;  %p1614_p1 = scmp.lt.s32.totalorder %s1612_s1, %s1605_s3 }
  0x50   : > { %p1615_p8 = por %p1614_p1, %p1613_p5 }
  0x52   : > { %p1616_p2 = pnand %p1615_p8, %p1609_p9 }
  0x54   : > { %1619 = shalt.err (!%p1616_p2)
}
  0x55   : > { %1432 = dma.hbm_to_vmem [thread:$0]  (!%p2085_p7), %s456_s21, 64, %s459_s8, %s446_s26  }
  0x56   : > { %s139_s7 = sadd.s32 1, %s1804_s17  ;;  %p146_p10 = scmp.ne.s32.totalorder %s1804_s17, %s1800_s16 }
  0x57   : > { %s2100_s9 = scalar_select %p137_p0, %s1804_s17, %s139_s7  }
  0x58   : > { %p2430_p1 = scmp.eq.s32.totalorder %s1836_s24, 0  ;;  %p2431_p3 = scmp.eq.s32.totalorder %s1989_s25, 3 }
  0x59   : > { %s474_s12 = sand.u32 1, %s1804_s17   ;;  %s1357_s18 = sshll.u32 %s1832_s23, 6 }
  0x5a   : > { %p148_p8 = por %p146_p10, %p2430_p1  ;;  %p2106_p6 = por %p2431_p3, %p146_p10 }
  0x5b   : > { %s1356_s30 = sshll.u32 %s474_s12, 2  ;;  %s2433_s4 = sld [smem:[#allocation30_spill]] }
  0x5c   : > { %s476_s8 = scalar_lea.vmem [#allocation7], %s1356_s30  ;;  %p2117_p7 = pnand %p1447_p13, %p148_p8 }
  0x5d   : > { %s483_s21 = sshll.u32 %s476_s8, 4  ;;  %s473_s26 = scalar_lea.sflag [#allocation8], %s472_s14  ;;  %s484_s21 = int_to_ptr.vmem [resolvable:$true] %s483_s21 }
  0x5e   : > { %p1622_p0 = pneg %p2117_p7  ;;  %s1633_s11 = scalar_lea.vmem %s484_s21, 64 }
  0x5f   : > { %p1634_p9 = scmp.ne.s32.totalorder %s484_s21, %s1633_s11  ;;  %s1840_s1 = smov [#allocation7]  }
  0x60   : > { %s1638_s7 = sshll.u32 %s1840_s1, 4  ;;  %s1639_s7 = int_to_ptr.vmem [resolvable:$false] %s1638_s7 }
  0x61   : > { %s481_s5 = scalar_lea.hbm %s2433_s4, %s1357_s18  ;;  %p1636_p5 = pnand %p1634_p9, %p1622_p0 }
  0x62   : > { %s1640_s12 = scalar_lea.vmem %s1639_s7, 128  ;;  %p1641_p10 = scmp.lt.s32.totalorder %s484_s21, %s1639_s7 }
  0x63   : > { %p1637_p2 = pneg %p1636_p5  ;;  %p1642_p1 = scmp.lt.s32.totalorder %s1640_s12, %s1633_s11 }
  0x65   : > { %p1643_p13 = por %p1642_p1, %p1641_p10 }
  0x67   : > { %p1644_p8 = pnand %p1643_p13, %p1637_p2 }
  0x69   : > { %1647 = shalt.err (!%p1644_p8)
}
  0x6a   : > { %1435 = dma.hbm_to_vmem [thread:$0]  (!%p2117_p7), %s481_s5, 64, %s484_s21, %s473_s26  }
  0x6b   : > { %492 = sbr.rel (%p2021_p11) target bundleno = 887 (0x377), region = 64  ;;  %s2130_s14 = sand.u32 (!%p2021_p11), 1, %s1812_s19  }
  0x6c   : > { %s2133_s30 = sshll.u32 (!%p2021_p11), %s2130_s14, 2  ;;  %s495_s18 = scalar_lea.sflag (!%p2021_p11), [#allocation5], %s2130_s14 }
  0x70   : > { %1771 = dma.done.wait (%p1999_p4), %s495_s18, 64  }
  0x71   : > { %1773 = vsyncadd (%p1999_p4), %s495_s18, 4294967232  ;;  %s2394_s15 = sand.u32 1, %s1989_s25   ;;  %s505_s3 = sand.u32 1, %s1800_s16  }
  0x72   : > { %s2143_s5 = sshll.u32 %s505_s3, 2  ;;  %s504_s8 = scalar_lea.sflag [#allocation8], %s2394_s15 }
  0x73   : > { %p2435_p11 = scmp.ne.s32.totalorder %s2414_s28, 0 }
  0x75   : > { %1775 = dma.done.wait (%p2435_p11), %s504_s8, 64  }
  0x76   : > { %1777 = vsyncadd (%p2435_p11), %s504_s8, 4294967232  ;;  %p2436_p3 = scmp.eq.s32.totalorder %s1989_s25, 0 }
  0x78   : > { %1779 = dma.done.wait (%p2436_p3), [#allocation8], 64   ;;  %p2437_p4 = pmov %p2436_p3 }
  0x79   : > { %s2438_s27 = sld [smem:[#allocation21_spill]]  ;;  %p581_p7 = scmp.lt.s32.totalorder %s1820_s0, 1  ;;  %v1841_v0 = vmov 0.0   ;;  %vm1842_vm0 = vmmov 0   ;;  %v1843_v1 = vmov 0   ;;  %vm601_vm1 = vcmask 64512  }
  0x7a   : > { %1781 = vsyncadd (%p2437_p4), [#allocation8], 4294967232  ;;  %1396 = vmatprep.subr.mxu0 %v1841_v0  ;;  %1398 = vmatprep.mubr.msk.f32.mxu0 %vm1842_vm0, %v1841_v0  ;;  %s2439_s18 = sld [smem:[#allocation27_spill]]  ;;  %v594_v2 = vld [vmem:[#allocation9] sm:$0xf]  ;;  %vm687_vm2 = vcmask 1043456   ;;  %v858_v12 = vlaneseq }
  0x7b   : > { %s582_s6 = scalar_select %p581_p7, %s1820_s0, 1  ;;  %1552 = vset.pattern.permute.xlu0 %v1843_v1  ;;  %1401 = vmatprep.subr.mxu1 %v1841_v0  ;;  %vm683_vm3 = vcmask 31744  }
  0x7c   : > { %1403 = vmatprep.mubr.msk.f32.mxu1 %vm1842_vm0, %v1841_v0  ;;  %1553 = vset.pattern.permute.xlu1 %v1843_v1  ;;  %s2440_s29 = sld [smem:[#allocation33_spill]]  ;;  %s573_s21 = scalar_lea.vmem [#allocation11], %s2133_s30 }
  0x7d   : > { %s1365_s26 = sshll.u32 %s582_s6, 1  ;;  %s2441_s4 = sld [smem:[#allocation35_spill]] }
  0x7e   : > { %s854_s6 = sld [smem:[#allocation3]]  ;;  %p1378_p9 = scmp.ne.s32.totalorder %s1820_s0, 0 }
  0x7f   : > { %p583_p0 = scmp.lt.s32.totalorder %s2438_s27, 1  ;;  %s1374_s15 = sshll.u32 %s2438_s27, 1 }
  0x80   : > { %s2442_s2 = sld [smem:[#allocation34_spill]] }
  0x81   : > { %s2161_s28 = scalar_select %p583_p0, %s2438_s27, 1 }
  0x82   : > { %v595_v3 = vld [vmem:[%s2440_s29] sm:$0xf]  ;;  %s2448_s27 = scalar_lea.vmem [#allocation4], %s2133_s30 }
  0x83   : > { %s586_s11 = sadd.s32 %s1365_s26, %s2161_s28  ;;  %598 = vperm.xlu0 %1552, %v595_v3   ;;  %v677_v5 = vld [vmem:[%s2441_s4] sm:$0xff] }
  0x84   : > { %s1366_s1 = sshll.u32 %s586_s11, 3  ;;  %s856_s29 = sadd.s32 %s1374_s15, %s854_s6 }
  0x85   : > { %s588_s3 = scalar_lea.vmem %s2439_s18, %s1366_s1  ;;  %s857_s4 = sadd.s32 %s1820_s0, %s856_s29 }
  0x86   : > { %v593_v4 = vld [vmem:[%s588_s3] sm:$0xff]  ;;  %v2181_v13 = vstv %s857_s4  ;;  %s2443_s1 = sld [smem:[#allocation37_spill]]  ;;  %s1367_s15 = sshll.u32 %s2161_s28, 2 }
  0x87   : > { %1397 = vmatpush3.msra.mxu0 %v593_v4  ;;  %680 = vperm.xlu0 %1552, %v677_v5   ;;  %v676_v11 = vld [vmem:[%s2442_s2] sm:$0xff]  ;;  %v862_v14 = vadd.s32 %v2181_v13, %v858_v12  ;;  %v860_v32 = vxor.u32 %v2181_v13, %v2181_v13  ;;  %s2444_s18 = sld [smem:[#allocation31_spill]]  ;;  %s2446_s29 = scalar_lea.vmem [#allocation7], %s2143_s5 }
  0x88   : > { %1399 = vmatmul.mubr.msk.f32.vlgmr.msra.gmra.mxu0 %vm601_vm1, %v594_v2  ;;  %1406 = vmatprep.subr.mxu0 %v1841_v0  ;;  %s2445_s6 = sld [smem:[#allocation36_spill]]  ;;  %s2395_s28 = scalar_lea.vmem [#allocation10], %s2133_s30 }
  0x89   : > { %1408 = vmatprep.mubr.msk.f32.mxu0 %vm1842_vm0, %v1841_v0  ;;  %v864_v15 = vshll.u32 %v862_v14, 13  ;;  %v865_v16 = vshrl.u32 %v862_v14, 19  ;;  %v863_v17 = vadd.s32 %v862_v14, %v862_v14  ;;  %v2186_v35 = vxor.u32 466688986, %v860_v32  ;;  %s2447_s2 = sld [smem:[#allocation29_spill]] }
  0x8b   : > { %v866_v18 = vor.u32 %v865_v16, %v864_v15 }
  0x8d   : > { %v867_v19 = vxor.u32 %v866_v18, %v863_v17  ;;  %v853_v15 = vld [vmem:[%s2444_s18] sm:$0xf] }
  0x8f   : > { %v869_v20 = vshll.u32 %v867_v19, 15  ;;  %v870_v21 = vshrl.u32 %v867_v19, 17  ;;  %v868_v22 = vadd.s32 %v867_v19, %v863_v17  ;;  %s592_s4 = scalar_lea.vmem %s2447_s2, %s1367_s15 }
  0x91   : > { %v871_v23 = vor.u32 %v870_v21, %v869_v20 }
  0x93   : > { %v872_v24 = vxor.u32 %v871_v23, %v868_v22 }
  0x95   : > { %v874_v25 = vshll.u32 %v872_v24, 26  ;;  %v875_v26 = vshrl.u32 %v872_v24, 6  ;;  %v873_v27 = vadd.s32 %v872_v24, %v868_v22 }
  0x97   : > { %v876_v28 = vor.u32 %v875_v26, %v874_v25 }
  0x99   : > { %v877_v29 = vxor.u32 %v876_v28, %v873_v27 }
  0x9b   : > { %v879_v30 = vshll.u32 %v877_v29, 6  ;;  %v880_v31 = vshrl.u32 %v877_v29, 26  ;;  %v878_v33 = vadd.s32 %v877_v29, %v873_v27 }
  0x9d   : > { %v881_v34 = vor.u32 %v880_v31, %v879_v30  ;;  %v883_v39 = vadd.s32 %v878_v33, %v2181_v13 }
  0x9f   : > { %v882_v36 = vxor.u32 %v881_v34, %v878_v33 }
  0xa1   : > { %v884_v37 = vadd.s32 %v882_v36, %v2186_v35 }
  0xa3   : > { %v885_v38 = vadd.s32 1, %v884_v37 }
  0xa5   : > { %v887_v40 = vshll.u32 %v885_v38, 17  ;;  %v888_v41 = vshrl.u32 %v885_v38, 15  ;;  %v886_v42 = vadd.s32 %v885_v38, %v883_v39 }
  0xa7   : > { %v889_v43 = vor.u32 %v888_v41, %v887_v40 }
  0xa9   : > { %v890_v44 = vxor.u32 %v889_v43, %v886_v42 }
  0xab   : > { %v892_v45 = vshll.u32 %v890_v44, 29  ;;  %v893_v46 = vshrl.u32 %v890_v44, 3  ;;  %v891_v47 = vadd.s32 %v890_v44, %v886_v42 }
  0xad   : > { %v894_v48 = vor.u32 %v893_v46, %v892_v45 }
  0xaf   : > { %v895_v49 = vxor.u32 %v894_v48, %v891_v47 }
  0xb1   : > { %v897_v50 = vshll.u32 %v895_v49, 16  ;;  %v898_v51 = vshrl.u32 %v895_v49, 16  ;;  %v896_v52 = vadd.s32 %v895_v49, %v891_v47 }
  0xb3   : > { %v899_v53 = vor.u32 %v898_v51, %v897_v50 }
  0xb5   : > { %v900_v54 = vxor.u32 %v899_v53, %v896_v52 }
  0xb7   : > { %v902_v55 = vshll.u32 %v900_v54, 24  ;;  %v903_v56 = vshrl.u32 %v900_v54, 8  ;;  %v901_v57 = vadd.s32 %v900_v54, %v896_v52 }
  0xb9   : > { %v904_v58 = vor.u32 %v903_v56, %v902_v55  ;;  %v906_v62 = vadd.s32 %v901_v57, %v2186_v35 }
  0xbb   : > { %v905_v59 = vxor.u32 %v904_v58, %v901_v57 }
  0xbd   : > { %v907_v60 = vadd.s32 %v905_v59, %v2181_v13 }
  0xbf   : > { %v908_v61 = vadd.s32 2, %v907_v60 }
  0xc1   : > { %v910_v63 = vshll.u32 %v908_v61, 13  ;;  %v911_v0 = vshrl.u32 %v908_v61, 19  ;;  %v909_v1 = vadd.s32 %v908_v61, %v906_v62 }
  0xc3   : > { %v912_v2 = vor.u32 %v911_v0, %v910_v63 }
  0xc5   : > { %v913_v3 = vxor.u32 %v912_v2, %v909_v1 }
  0xc7   : > { %v915_v4 = vshll.u32 %v913_v3, 15  ;;  %v916_v5 = vshrl.u32 %v913_v3, 17 }
  0xfe   : > { %v599_v6 = vpop.permute.xlu0 %598 }
 0x148   : > { %v671_v7 = vpop.f32.mrf.mxu0 }
 0x149   : > { %v672_v8 = vadd.f32 %v671_v7, %v599_v6  ;;  %v914_v6 = vadd.s32 %v913_v3, %v909_v1  ;;  %v917_v7 = vor.u32 %v916_v5, %v915_v4 }
 0x14a   : > { %v1400_v9 = vpop.f32.mrf.mxu0 }
 0x14b   : > { %v675_v10 = vmax.f32 %v672_v8, 0.0  ;;  %v918_v8 = vxor.u32 %v917_v7, %v914_v6 }
 0x14d   : > { %1402 = vmatpush3.msk.msra.mxu1 %vm687_vm2, %v675_v10  ;;  %v920_v9 = vshll.u32 %v918_v8, 26  ;;  %v921_v10 = vshrl.u32 %v918_v8, 6  ;;  %v919_v12 = vadd.s32 %v918_v8, %v914_v6 }
 0x14e   : > { %1404 = vmatmul.mubr.msk.f32.vlgmr.msra.gmra.mxu1 %vm683_vm3, %v676_v11  ;;  %v763_v11 = vld [vmem:[%s2443_s1] sm:$0xf]  ;;  %s2240_s1 = scalar_lea.vmem [#allocation13], %s2143_s5 }
 0x14f   : > { %766 = vperm.xlu1 %1553, %v763_v11   ;;  %v922_v14 = vor.u32 %v921_v10, %v920_v9  ;;  %v681_v9 = vpop.permute.xlu0 %680 }
 0x151   : > { %v923_v16 = vxor.u32 %v922_v14, %v919_v12 }
 0x153   : > { %1050 = vperm.xlu1 %1553, %v853_v15   ;;  %v924_v17 = vadd.s32 %v923_v16, %v919_v12  ;;  %v925_v18 = vshll.u32 %v923_v16, 6  ;;  %v926_v19 = vshrl.u32 %v923_v16, 26  ;;  %v762_v15 = vld [vmem:[%s2445_s6] sm:$0xf] }
 0x155   : > { %v927_v20 = vor.u32 %v926_v19, %v925_v18  ;;  %v929_v22 = vadd.s32 %v924_v17, %v2181_v13 }
 0x157   : > { %v928_v21 = vxor.u32 %v927_v20, %v924_v17 }
 0x159   : > { %v930_v23 = vadd.s32 %v928_v21, %v2181_v13 }
 0x15b   : > { %v931_v24 = vadd.s32 3, %v930_v23 }
 0x15d   : > { %v932_v25 = vadd.s32 %v931_v24, %v929_v22  ;;  %v933_v26 = vshll.u32 %v931_v24, 17  ;;  %v934_v27 = vshrl.u32 %v931_v24, 15 }
 0x15f   : > { %v935_v28 = vor.u32 %v934_v27, %v933_v26 }
 0x161   : > { %v936_v29 = vxor.u32 %v935_v28, %v932_v25 }
 0x163   : > { %v937_v30 = vadd.s32 %v936_v29, %v932_v25  ;;  %v938_v31 = vshll.u32 %v936_v29, 29  ;;  %v939_v32 = vshrl.u32 %v936_v29, 3 }
 0x165   : > { %v940_v33 = vor.u32 %v939_v32, %v938_v31 }
 0x167   : > { %v941_v34 = vxor.u32 %v940_v33, %v937_v30 }
 0x169   : > { %v942_v36 = vadd.s32 %v941_v34, %v937_v30  ;;  %v943_v37 = vshll.u32 %v941_v34, 16  ;;  %v944_v38 = vshrl.u32 %v941_v34, 16 }
 0x16b   : > { %v945_v39 = vor.u32 %v944_v38, %v943_v37 }
 0x16d   : > { %v946_v40 = vxor.u32 %v945_v39, %v942_v36 }
 0x16f   : > { %v947_v41 = vadd.s32 %v946_v40, %v942_v36  ;;  %v948_v42 = vshll.u32 %v946_v40, 24  ;;  %v949_v43 = vshrl.u32 %v946_v40, 8 }
 0x171   : > { %v950_v44 = vor.u32 %v949_v43, %v948_v42  ;;  %v952_v46 = vadd.s32 %v947_v41, %v2181_v13 }
 0x173   : > { %v951_v45 = vxor.u32 %v950_v44, %v947_v41  ;;  %v1844_v41 = vmov -0.00020021426   ;;  %v1845_v44 = vmov 0.00010095056  }
 0x175   : > { %v953_v47 = vadd.s32 %v951_v45, %v2186_v35 }
 0x177   : > { %v954_v48 = vadd.s32 4, %v953_v47 }
 0x179   : > { %v955_v49 = vadd.s32 %v954_v48, %v952_v46  ;;  %v956_v50 = vshll.u32 %v954_v48, 13  ;;  %v957_v51 = vshrl.u32 %v954_v48, 19  ;;  %v1846_v48 = vmov 0.0013493432  }
 0x17b   : > { %v958_v52 = vor.u32 %v957_v51, %v956_v50 }
 0x17d   : > { %v959_v53 = vxor.u32 %v958_v52, %v955_v49  ;;  %v1847_v52 = vmov -0.0036734284  }
 0x17f   : > { %v960_v54 = vadd.s32 %v959_v53, %v955_v49  ;;  %v961_v55 = vshll.u32 %v959_v53, 15  ;;  %v962_v56 = vshrl.u32 %v959_v53, 17 }
 0x181   : > { %v963_v57 = vor.u32 %v962_v56, %v961_v55  ;;  %v1848_v56 = vmov 0.0057395077  }
 0x183   : > { %v964_v58 = vxor.u32 %v963_v57, %v960_v54 }
 0x185   : > { %v965_v59 = vadd.s32 %v964_v58, %v960_v54  ;;  %v966_v60 = vshll.u32 %v964_v58, 26  ;;  %v967_v61 = vshrl.u32 %v964_v58, 6 }
 0x187   : > { %v968_v62 = vor.u32 %v967_v61, %v966_v60  ;;  %v1849_v60 = vmov -0.0076224613  }
 0x189   : > { %v969_v63 = vxor.u32 %v968_v62, %v965_v59 }
 0x18b   : > { %v970_v0 = vadd.s32 %v969_v63, %v965_v59  ;;  %v971_v1 = vshll.u32 %v969_v63, 6  ;;  %v972_v2 = vshrl.u32 %v969_v63, 26 }
 0x18d   : > { %v973_v3 = vor.u32 %v972_v2, %v971_v1  ;;  %v975_v5 = vadd.s32 %v970_v0, %v2186_v35 }
 0x18f   : > { %v974_v4 = vxor.u32 %v973_v3, %v970_v0  ;;  %v1850_v0 = vmov 0.0094388705  }
 0x191   : > { %v976_v6 = vadd.s32 %v974_v4, %v2181_v13 }
 0x193   : > { %v977_v7 = vadd.s32 5, %v976_v6 }
 0x195   : > { %v978_v8 = vxor.u32 %v977_v7, %v975_v5 }
 0x197   : > { %979 = set.rngseed %v978_v8 }
 0x198   : > { %v980_v16 = vrng }
 0x199   : > { %v981_v17 = vshrl.u32 %v980_v16, 9 }
 0x19b   : > { %v982_v35 = vor.u32 1065353216, %v981_v17 }
 0x19d   : > { %v1375_v18 = vadd.f32 -1.0, %v982_v35 }
 0x19f   : > { %v985_v13 = vmul.f32 2.0, %v1375_v18 }
 0x1a1   : > { %v986_v19 = vadd.f32 -0.99999994, %v985_v13 }
 0x1a3   : > { %v2208_v20 = vmax.f32 %v986_v19, -0.99999994 }
 0x1a5   : > { %v988_v21 = vsub.f32 0.0, %v2208_v20  ;;  %v1036_v35 = vand.u32 2147483647, %v2208_v20  ;;  %v1038_v19 = vmul.f32 inf, %v2208_v20 }
 0x1a7   : > { %v989_v22 = vmul.f32 %v988_v21, %v2208_v20  ;;  %vm1037_vm8 = vcmp.eq.f32.partialorder %v1036_v35, 1.0 }
 0x1a9   : > { %v990_v23 = vadd.f32 1.0, %v989_v22  ;;  %v993_v24 = vmul.f32 -0.5, %v989_v22  ;;  %v996_v27 = vand.u32 2147483647, %v989_v22 }
 0x1ab   : > { %1554 = vlog2.f32 %v990_v23  ;;  %v994_v25 = vadd.f32 1.0, %v993_v24  ;;  %vm997_vm4 = vcmp.lt.f32.partialorder %v996_v27, 0.0004427343  ;;  %v852_v24 = vld [vmem:[%s2446_s29] sm:$0xf] }
 0x1ad   : > { %v995_v29 = vmul.f32 %v994_v25, %v989_v22 }
 0x1b8   : > { %v1555_v26 = vpop.eup %1554 }
 0x1b9   : > { %v992_v28 = vmul.f32 0.6931472, %v1555_v26  ;;  %v851_v26 = vld [vmem:[%s592_s4] sm:$0xf] }
 0x1bb   : > { %v998_v30 = vsel %vm997_vm4, %v995_v29, %v992_v28  ;;  %v850_v29 = vld [vmem:[%s2448_s27] sm:$0xf] }
 0x1bc   : > { %v999_v31 = vsub.f32 0.0, %v998_v30 }
 0x1be   : > { %1556 = vrsqrt.f32 %v999_v31  ;;  %vm1004_vm5 = vcmp.eq.f32.partialorder %v999_v31, inf  ;;  %v1007_v34 = vand.u32 2147483648, %v999_v31  ;;  %vm1006_vm6 = vcmp.eq.f32.partialorder %v999_v31, 0.0 }
 0x1bf   : > { %v1376_v38 = vadd.f32 -2.5, %v999_v31  ;;  %vm1000_vm7 = vcmp.lt.f32.partialorder %v999_v31, 5.0 }
 0x1c0   : > { %v1011_v42 = vsel %vm1000_vm7, 2.8102264e-08, %v1844_v41  ;;  %v1012_v45 = vsel %vm1000_vm7, 3.4327394e-07, %v1845_v44  ;;  %v1015_v49 = vsel %vm1000_vm7, -3.5233877e-06, %v1846_v48 }
 0x1c1   : > { %v1018_v53 = vsel %vm1000_vm7, -4.3915065e-06, %v1847_v52  ;;  %v1021_v57 = vsel %vm1000_vm7, 0.00021858087, %v1848_v56  ;;  %v1024_v61 = vsel %vm1000_vm7, -0.001253725, %v1849_v60 }
 0x1c2   : > { %v1027_v1 = vsel %vm1000_vm7, -0.0041776816, %v1850_v0 }
 0x1ca   : > { %v767_v2 = vpop.permute.xlu1 %766 }
 0x1cb   : > { %v1557_v32 = vpop.eup %1556 }
 0x1cc   : > { %v1003_v33 = vmul.f32 %v1557_v32, %v999_v31 }
 0x1ce   : > { %v1005_v36 = vsel %vm1004_vm5, %v999_v31, %v1003_v33 }
 0x1cf   : > { %v1008_v37 = vsel %vm1006_vm6, %v1007_v34, %v1005_v36  ;;  %v1051_v34 = vpop.permute.xlu1 %1050 }
 0x1d0   : > { %v1377_v39 = vadd.f32 -3.0, %v1008_v37  ;;  %v1055_v37 = vsub.f32 %v850_v29, %v851_v26 }
 0x1d2   : > { %v1010_v40 = vsel %vm1000_vm7, %v1376_v38, %v1377_v39 }
 0x1d3   : > { %v1013_v43 = vmul.f32 %v1011_v42, %v1010_v40 }
 0x1d5   : > { %v1014_v46 = vadd.f32 %v1013_v43, %v1012_v45 }
 0x1d7   : > { %v1016_v47 = vmul.f32 %v1014_v46, %v1010_v40 }
 0x1d9   : > { %v1017_v50 = vadd.f32 %v1016_v47, %v1015_v49 }
 0x1db   : > { %v1019_v51 = vmul.f32 %v1017_v50, %v1010_v40 }
 0x1dd   : > { %v1020_v54 = vadd.f32 %v1019_v51, %v1018_v53 }
 0x1df   : > { %v1022_v55 = vmul.f32 %v1020_v54, %v1010_v40 }
 0x1e1   : > { %v1023_v58 = vadd.f32 %v1022_v55, %v1021_v57 }
 0x1e3   : > { %v1025_v59 = vmul.f32 %v1023_v58, %v1010_v40 }
 0x1e5   : > { %v1026_v62 = vadd.f32 %v1025_v59, %v1024_v61 }
 0x1e7   : > { %v1028_v63 = vmul.f32 %v1026_v62, %v1010_v40 }
 0x1e9   : > { %v1029_v5 = vadd.f32 %v1028_v63, %v1027_v1 }
 0x20e   : > { %v757_v10 = vpop.f32.mrf.mxu1 }
 0x20f   : > { %v758_v11 = vadd.f32 %v757_v10, %v681_v9  ;;  %v1031_v9 = vmul.f32 %v1029_v5, %v1010_v40  ;;  %v1851_v10 = vmov 1.001674  }
 0x210   : > { %v1405_v12 = vpop.f32.mrf.mxu1 }
 0x211   : > { %v761_v14 = vmax.f32 %v758_v11, 0.0  ;;  %v1030_v11 = vsel %vm1000_vm7, 0.24664073, %v1851_v10 }
 0x212   : > { %v1032_v12 = vadd.f32 %v1031_v9, %v1030_v11 }
 0x213   : > { %1407 = vmatpush3.msra.mxu0 %v761_v14 }
 0x214   : > { %1409 = vmatmul.mubr.msk.f32.vlgmr.msra.gmra.mxu0 %vm601_vm1, %v762_v15  ;;  %v1034_v14 = vmul.f32 %v1032_v12, %v1010_v40  ;;  %v1852_v15 = vmov 2.8329768  }
 0x215   : > { %v1033_v16 = vsel %vm1000_vm7, 1.5014094, %v1852_v15 }
 0x216   : > { %v1035_v17 = vadd.f32 %v1034_v14, %v1033_v16 }
 0x218   : > { %v1039_v21 = vmul.f32 %v1035_v17, %v2208_v20 }
 0x21a   : > { %v1040_v22 = vsel %vm1037_vm8, %v1038_v19, %v1039_v21 }
 0x21b   : > { %v1041_v23 = vmul.f32 1.4142135, %v1040_v22 }
 0x21d   : > { %v1042_v25 = vmul.f32 %v1041_v23, %v852_v24 }
 0x21f   : > { %v1043_v20 = vadd.f32 %v1042_v25, %v851_v26 }
 0x2d4   : > { %v838_v3 = vpop.f32.mrf.mxu0 }
 0x2d5   : > { %v839_v4 = vadd.f32 %v838_v3, %v767_v2 }
 0x2d6   : > { %v1410_v6 = vpop.f32.mrf.mxu0 }
 0x2d7   : > { %v1372_v7 = vclamps-f32 %v839_v4, 5.0 }
 0x2d9   : > { %v1373_v8 = vmul.f32 -1.442695, %v1372_v7 }
 0x2db   : > { %1558 = vpow2.f32 %v1373_v8 }
 0x2e8   : > { %v1559_v18 = vpop.eup %1558 }
 0x2e9   : > { %v847_v13 = vadd.f32 1.0, %v1559_v18 }
 0x2eb   : > { %1560 = vrcp.f32 %v847_v13 }
 0x2ec   : > { %1562 = vrcp.f32 %v852_v24 }
 0x2f8   : > { %v1561_v27 = vpop.eup %1560 }
 0x2f9   : > { %1068 = vst [vmem:[%s573_s21] sm:$0xf] %v1561_v27  ;;  %v1044_v28 = vsub.f32 1.0, %v1561_v27  ;;  %v1045_v30 = vmul.f32 %v1561_v27, %v850_v29  ;;  %v1563_v38 = vpop.eup %1562 }
 0x2fa   : > { %v1056_v39 = vmul.f32 %v1563_v38, %v1055_v37 }
 0x2fb   : > { %v1046_v31 = vmul.f32 %v1044_v28, %v1043_v20  ;;  %v1057_v32 = vmul.f32 %v1044_v28, %v1044_v28 }
 0x2fc   : > { %v1058_v40 = vmul.f32 %v1561_v27, %v1056_v39 }
 0x2fd   : > { %v1047_v33 = vadd.f32 %v1046_v31, %v1045_v30  ;;  %1564 = vlog2.f32 %v1057_v32 }
 0x2fe   : > { %v1062_v44 = vmul.f32 %v1058_v40, %v1058_v40 }
 0x2ff   : > { %v1053_v36 = vmul.f32 %v1051_v34, %v1047_v33 }
 0x301   : > { %1067 = vst [vmem:[%s2395_s28] sm:$0xf] %v1053_v36 }
 0x30a   : > { %v1565_v41 = vpop.eup %1564 }
 0x30b   : > { %v1060_v42 = vmul.f32 0.6931472, %v1565_v41 }
 0x30d   : > { %v1061_v43 = vadd.f32 1.0, %v1060_v42 }
 0x30f   : > { %v1063_v45 = vsub.f32 %v1061_v43, %v1062_v44 }
 0x311   : > { %v1064_v46 = vsub.f32 %v1063_v45, %v1057_v32  ;;  %1072 = sbr.rel (%p1378_p9) target bundleno = 792 (0x318), region = 80 }
 0x313   : > { %v1065_v47 = vmul.f32 -0.5, %v1064_v46 }
 0x315   : > { %v1066_v48 = vmul.f32 %v1065_v47, %v1051_v34 }
 0x316   : > { %v1853_v49 = vmov 0.0  }
 0x317   : > { %1073 = vst [vmem:[%s2240_s1] sm:$0xf] %v1853_v49 }
 0x318 PF: > { %p1379_p5 = scmp.ne.s32.totalorder %s1820_s0, 1 }
 0x31d   : > { %1080 = sbr.rel (%p1379_p5) target bundleno = 812 (0x32c), region = 84 }
 0x31e   : > { %v1074_v50 = vld [vmem:[%s2240_s1] sm:$0xf] }
 0x31f   : > { %v1075_v51 = vadd.f32 %v1074_v50, %v1066_v48 }
 0x321   : > { %1076 = vst [vmem:[%s2240_s1] sm:$0xf] %v1075_v51 }
 0x328   : > { %v1081_v52 = vld [vmem:[%s2240_s1] sm:$0xf] }
 0x329   : > { %v1082_v53 = vmul.f32 0.5, %v1081_v52 }
 0x32b   : > { %1083 = vst [vmem:[%s2240_s1] sm:$0xf] %v1082_v53 }
 0x32c PF: > { %s2449_s5 = sld [smem:[#allocation21_spill]]  ;;  %s1383_s12 = sshll.u32 %s1820_s0, 1 }
 0x32d   : > { %s1125_s3 = sshll.u32 %s573_s21, 4  ;;  %s2451_s29 = sld [smem:[#allocation39_spill]]  ;;  %s1126_s3 = int_to_ptr.vmem [resolvable:$true] %s1125_s3 }
 0x32e   : > { %s2452_s11 = sand.u32 1, %s1989_s25   ;;  %s1648_s4 = scalar_lea.vmem %s1126_s3, 64 }
 0x32f   : > { %s2263_s2 = scalar_lea.sflag [#allocation12], %s2452_s11  ;;  %p1649_p2 = scmp.ne.s32.totalorder %s1126_s3, %s1648_s4 }
 0x330   : > { %s1854_s0 = smov [#allocation11]  }
 0x331   : > { %p1650_p10 = pnand %p1649_p2, %p2053_p12  ;;  %s1652_s27 = sshll.u32 %s1854_s0, 4  ;;  %s1653_s27 = int_to_ptr.vmem [resolvable:$false] %s1652_s27 }
 0x332   : > { %s2251_s18 = sadd.s32 %s2449_s5, %s1383_s12  ;;  %s1654_s12 = scalar_lea.vmem %s1653_s27, 128 }
 0x333   : > { %s1384_s8 = sshll.u32 %s2251_s18, 6  ;;  %p1651_p1 = pneg %p1650_p10 }
 0x334   : > { %s1123_s26 = scalar_lea.hbm %s2451_s29, %s1384_s8  ;;  %p1655_p13 = scmp.lt.s32.totalorder %s1126_s3, %s1653_s27 }
 0x335   : > { %p1656_p8 = scmp.lt.s32.totalorder %s1654_s12, %s1648_s4 }
 0x337   : > { %p1657_p11 = por %p1656_p8, %p1655_p13 }
 0x339   : > { %p1658_p3 = pnand %p1657_p11, %p1651_p1 }
 0x33b   : > { %1661 = shalt.err (!%p1658_p3)
}
 0x33c   : > { %s1662_s21 = scalar_lea.hbm %s1123_s26, 64  ;;  %s1666_s15 = scalar_lea.hbm %s2451_s29, 256 }
 0x33d   : > { %p1663_p4 = scmp.ne.s32.totalorder %s1123_s26, %s1662_s21  ;;  %p1667_p9 = scmp.lt.s32.totalorder %s1123_s26, %s2451_s29 }
 0x33e   : > { %p1668_p5 = scmp.lt.s32.totalorder %s1666_s15, %s1662_s21 }
 0x33f   : > { %p1664_p7 = pnand %p1663_p4, %p2053_p12 }
 0x340   : > { %p1669_p2 = por %p1668_p5, %p1667_p9 }
 0x341   : > { %p1665_p0 = pneg %p1664_p7 }
 0x343   : > { %p1670_p10 = pnand %p1669_p2, %p1665_p0 }
 0x345   : > { %1673 = shalt.err (!%p1670_p10)
}
 0x346   : > { %1420 = dma.vmem_to_hbm [thread:$0]  (%p2053_p12), %s1126_s3, 64, %s1123_s26, %s2263_s2  }
 0x347   : > { %s2453_s27 = sld [smem:[#allocation38_spill]]  ;;  %s2454_s28 = scalar_lea.vmem [#allocation10], %s2133_s30 }
 0x348   : > { %s1110_s21 = sshll.u32 %s2454_s28, 4  ;;  %s1387_s25 = sshll.u32 %s2449_s5, 6  ;;  %s1111_s21 = int_to_ptr.vmem [resolvable:$true] %s1110_s21 }
 0x349   : > { %s1085_s6 = scalar_lea.sflag [#allocation6], %s2130_s14  ;;  %s1674_s15 = scalar_lea.vmem %s1111_s21, 64 }
 0x34a   : > { %p1675_p1 = scmp.ne.s32.totalorder %s1111_s21, %s1674_s15  ;;  %s1855_s11 = smov [#allocation10]  }
 0x34b   : > { %s1678_s29 = sshll.u32 %s1855_s11, 4  ;;  %s1679_s29 = int_to_ptr.vmem [resolvable:$false] %s1678_s29 }
 0x34c   : > { %p1676_p13 = pnand %p1675_p1, %p2053_p12  ;;  %s1680_s3 = scalar_lea.vmem %s1679_s29, 128 }
 0x34d   : > { %s2283_s12 = scalar_lea.hbm %s2453_s27, %s1384_s8  ;;  %p1681_p11 = scmp.lt.s32.totalorder %s1111_s21, %s1679_s29 }
 0x34e   : > { %p1677_p8 = pneg %p1676_p13  ;;  %p1682_p3 = scmp.lt.s32.totalorder %s1680_s3, %s1674_s15 }
 0x350   : > { %p1683_p4 = por %p1682_p3, %p1681_p11 }
 0x352   : > { %p1684_p7 = pnand %p1683_p4, %p1677_p8 }
 0x354   : > { %1687 = shalt.err (!%p1684_p7)
}
 0x355   : > { %s1688_s30 = scalar_lea.hbm %s2283_s12, 64  ;;  %s1692_s18 = scalar_lea.hbm %s2453_s27, 256 }
 0x356   : > { %p1689_p0 = scmp.ne.s32.totalorder %s2283_s12, %s1688_s30  ;;  %p1693_p2 = scmp.lt.s32.totalorder %s2283_s12, %s2453_s27 }
 0x357   : > { %p1694_p10 = scmp.lt.s32.totalorder %s1692_s18, %s1688_s30 }
 0x358   : > { %p1690_p9 = pnand %p1689_p0, %p2053_p12 }
 0x359   : > { %p1695_p1 = por %p1694_p10, %p1693_p2 }
 0x35a   : > { %p1691_p5 = pneg %p1690_p9 }
 0x35c   : > { %p1696_p13 = pnand %p1695_p1, %p1691_p5 }
 0x35e   : > { %1699 = shalt.err (!%p1696_p13)
}
 0x35f   : > { %1419 = dma.vmem_to_hbm [thread:$0]  (%p2053_p12), %s1111_s21, 64, %s2283_s12, %s1085_s6  }
 0x360   : > { %s2455_s0 = sld [smem:[#allocation40_spill]]  ;;  %s1138_s11 = sshll.u32 %s2240_s1, 4  ;;  %s1139_s11 = int_to_ptr.vmem [resolvable:$true] %s1138_s11 }
 0x361   : > { %s1700_s3 = scalar_lea.vmem %s1139_s11, 64  ;;  %s1856_s30 = smov [#allocation13]  }
 0x362   : > { %p1701_p8 = scmp.ne.s32.totalorder %s1139_s11, %s1700_s3  ;;  %s1704_s14 = sshll.u32 %s1856_s30, 4  ;;  %s1705_s14 = int_to_ptr.vmem [resolvable:$false] %s1704_s14 }
 0x363   : > { %s1706_s5 = scalar_lea.vmem %s1705_s14, 128  ;;  %p1707_p4 = scmp.lt.s32.totalorder %s1139_s11, %s1705_s14 }
 0x364   : > { %p1702_p11 = pnand %p1701_p8, %p2106_p6  ;;  %p1708_p7 = scmp.lt.s32.totalorder %s1706_s5, %s1700_s3 }
 0x366   : > { %s2456_s28 = smov %s2455_s0  ;;  %s1136_s15 = scalar_lea.hbm %s2455_s0, %s1387_s25 }
 0x367   : > { %p1703_p3 = pneg %p1702_p11  ;;  %p1709_p0 = por %p1708_p7, %p1707_p4 }
 0x369   : > { %p1710_p9 = pnand %p1709_p0, %p1703_p3 }
 0x36b   : > { %1713 = shalt.err (!%p1710_p9)
}
 0x36c   : > { %s1714_s7 = scalar_lea.hbm %s1136_s15, 64  ;;  %s1718_s21 = scalar_lea.hbm %s2456_s28, 128 }
 0x36d   : > { %p1715_p12 = scmp.ne.s32.totalorder %s1136_s15, %s1714_s7  ;;  %p1719_p10 = scmp.lt.s32.totalorder %s1136_s15, %s2456_s28 }
 0x36e   : > { %p1720_p1 = scmp.lt.s32.totalorder %s1718_s21, %s1714_s7 }
 0x36f   : > { %p1716_p5 = pnand %p1715_p12, %p2106_p6 }
 0x370   : > { %p1721_p13 = por %p1720_p1, %p1719_p10 }
 0x371   : > { %p1717_p2 = pneg %p1716_p5 }
 0x373   : > { %p1722_p8 = pnand %p1721_p13, %p1717_p2 }
 0x375   : > { %1725 = shalt.err (!%p1722_p8)
}
 0x376   : > { %1421 = dma.vmem_to_hbm [thread:$0]  (%p2106_p6), %s1139_s11, 64, %s1136_s15, %s2263_s2  }
 0x377 PF: > { %s2457_s18 = sld [smem:[#allocation20_spill]]  ;;  %p1449_p11 = scmp.ge.s32.totalorder %s1836_s24, 2 }
 0x378   : > { %s2458_s8 = sld [smem:[#allocation22_spill]] }
 0x37d   : > { %s1150_s26 = sand.u32 1, %s2457_s18  }
 0x37e   : > { %p2459_p3 = scmp.ne.s32.totalorder %s2458_s8, 0  ;;  %s1151_s29 = scalar_lea.sflag [#allocation6], %s1150_s26 }
 0x380   : > { %p1437_p4 = pnand %p1449_p11, %p2459_p3 }
 0x382   : > { %p1438_p7 = pneg %p1437_p4 }
 0x384   : > { %1783 = dma.done.wait (%p1438_p7), %s1151_s29, 64  }
 0x385   : > { %1785 = vsyncadd (%p1438_p7), %s1151_s29, 4294967232  ;;  %s2460_s4 = sadd.s32 4294967294, %s1836_s24  }
 0x386   : > { %s1159_s0 = sand.u32 1, %s2460_s4  }
 0x387   : > { %s1160_s3 = scalar_lea.sflag [#allocation12], %s1159_s0 }
 0x388   : > { %1787 = dma.done.wait (%p1438_p7), %s1160_s3, 64  }
 0x389   : > { %1789 = vsyncadd (%p1438_p7), %s1160_s3, 4294967232  ;;  %s2461_s13 = sld [smem:[#allocation23_spill]] }
 0x38f   : > { %p2462_p6 = scmp.ne.s32.totalorder %s2461_s13, 0 }
 0x391   : > { %p1443_p0 = pnand %p1449_p11, %p2462_p6 }
 0x393   : > { %p1444_p9 = pneg %p1443_p0 }
 0x395   : > { %1791 = dma.done.wait (%p1444_p9), %s1160_s3, 64  }
 0x396   : > { %1793 = vsyncadd (%p1444_p9), %s1160_s3, 4294967232  ;;  %s38_s24 = sadd.s32 1, %s1836_s24   ;;  %s2463_s2 = sld [smem:[#allocation24_spill]] }
 0x397   : > { %p35_p12 = scmp.ge.s32.totalorder %s38_s24, 6   ;;  %s2464_s11 = sld [smem:[#allocation26_spill]] }
 0x398   : > { %s2465_s15 = smov %s1800_s16  ;;  %s2466_s16 = smov %s1804_s17 }
 0x399   : > { %s2467_s17 = smov %s2100_s9  ;;  %s2468_s18 = smov %s1812_s19 }
 0x39a   : > { %s2469_s19 = smov %s1816_s20  ;;  %s2470_s20 = smov %s2075_s10 }
 0x39b   : > { %s2471_s0 = smov %s1828_s22  ;;  %s2472_s21 = smov %s1832_s23 }
 0x39c   : > { %s2473_s22 = smov %s2463_s2  ;;  %37 = sbr.rel (!%p35_p12) target bundleno = 29 (0x1d), region = 172 }
 0x39d   : > { %s2474_s23 = smov %s2464_s11 }
 0x3a1   :  { %1174 = vsyncpa [#allocation5], 1 }
 0x3a2   :  { %1176 = vsyncpa [#allocation5 + $0x1], 1 }
 0x3a3   :  { %1177 = vsyncpa [#allocation8], 1 }
 0x3a4   :  { %1179 = vsyncpa [#allocation8 + $0x1], 1 }
 0x3a5   :  { %1180 = vsyncpa [#allocation6], 1 }
 0x3a6   :  { %1182 = vsyncpa [#allocation6 + $0x1], 1 }
 0x3a7   :  { %1183 = vsyncpa [#allocation12], 1 }
 0x3a8   :  { %1185 = vsyncpa [#allocation12 + $0x1], 1 }

// kernel: tpu_custom_call.1
= control target key start
LH: loop header
LB: loop body
LE: loop exit
PB: predicated region body
PF: predicated region fallthrough
CT: control target
= control target key end

     0   :  { %s2291_s0 = inlined_call_operand.vmem [shape: f32[2,8,256], index: 0, kind: input, shape index: {}]   ;;  %s2292_s1 = inlined_call_operand.hbm [shape: f32[2,4,256], index: 1, kind: input, shape index: {}]   ;;  %s2293_s2 = inlined_call_operand.hbm [shape: f32[2,4,256], index: 2, kind: input, shape index: {}]   ;;  %s2294_s3 = inlined_call_operand.vmem [shape: f32[4,256], index: 3, kind: input, shape index: {}]   ;;  %s2295_s4 = inlined_call_operand.hbm [shape: f32[4,256], index: 4, kind: input, shape index: {}]   ;;  %s2296_s5 = inlined_call_operand.vmem [shape: f32[4,1], index: 5, kind: input, shape index: {}]   ;;  %s2297_s6 = inlined_call_operand.hbm [shape: f32[4,8], index: 6, kind: input, shape index: {}]   ;;  %s2298_s7 = inlined_call_operand.vmem [shape: f32[4,1], index: 7, kind: input, shape index: {}]   ;;  %s2299_s8 = inlined_call_operand.vmem [shape: f32[8,4], index: 8, kind: input, shape index: {}]   ;;  %s2300_s9 = inlined_call_operand.vmem [shape: f32[8,1], index: 9, kind: input, shape index: {}]   ;;  %s2301_s10 = inlined_call_operand.vmem [shape: f32[4,8], index: 10, kind: input, shape index: {}]   ;;  %s2302_s11 = inlined_call_operand.vmem [shape: f32[4,1], index: 11, kind: input, shape index: {}]   ;;  %s2303_s12 = inlined_call_operand.hbm [shape: f32[2,4,256], index: 12, kind: output, shape index: {0}]   ;;  %s2304_s13 = inlined_call_operand.hbm [shape: f32[2,4,256], index: 13, kind: output, shape index: {1}]   ;;  %s2305_s14 = inlined_call_operand.hbm [shape: f32[4,256], index: 14, kind: output, shape index: {2}]  }
   0x1   :  { %2333 = sst [smem:[#allocation30_spill]] %s2291_s0 }
   0x2   :  { %2334 = sst [smem:[#allocation31_spill]] %s2292_s1 }
   0x3   :  { %2335 = sst [smem:[#allocation32_spill]] %s2293_s2 }
   0x4   :  { %2336 = sst [smem:[#allocation33_spill]] %s2294_s3 }
   0x5   :  { %2337 = sst [smem:[#allocation34_spill]] %s2295_s4 }
   0x6   :  { %2338 = sst [smem:[#allocation35_spill]] %s2296_s5 }
   0x7   :  { %2339 = sst [smem:[#allocation36_spill]] %s2298_s7 }
   0x8   :  { %2340 = sst [smem:[#allocation37_spill]] %s2299_s8 }
   0x9   :  { %2341 = sst [smem:[#allocation38_spill]] %s2300_s9 }
   0xa   :  { %2342 = sst [smem:[#allocation39_spill]] %s2301_s10 }
   0xb   :  { %2343 = sst [smem:[#allocation40_spill]] %s2302_s11 }
   0xc   :  { %2344 = sst [smem:[#allocation41_spill]] %s2303_s12 }
   0xd   :  { %2345 = sst [smem:[#allocation42_spill]] %s2304_s13 }
   0xe   :  { %2346 = sst [smem:[#allocation43_spill]] %s2305_s14 }
   0xf   :  { %20 = vsyncpa [#allocation3], 0 }
  0x10   :  { %22 = vsyncpa [#allocation3 + $0x1], 0 }
  0x11   :  { %23 = vsyncpa [#allocation6], 0 }
  0x12   :  { %25 = vsyncpa [#allocation6 + $0x1], 0 }
  0x13   :  { %26 = vsyncpa [#allocation9], 0 }
  0x14   :  { %27 = vsyncpa [#allocation4], 0 }
  0x15   :  { %29 = vsyncpa [#allocation4 + $0x1], 0 }
  0x16   :  { %30 = vsyncpa [#allocation12], 0 }
  0x17   :  { %32 = vsyncpa [#allocation12 + $0x1], 0  ;;  %s1848_s29 = smov 0   ;;  %s1850_s30 = smov 0  }
  0x18   :  { %s1852_s15 = smov 0   ;;  %s1854_s16 = smov 0  }
  0x19   :  { %s1856_s17 = smov 0   ;;  %s1858_s18 = smov 0  }
  0x1a   :  { %s1860_s19 = smov 0   ;;  %s1862_s20 = smov 0  }
  0x1b   :  { %s1864_s21 = smov 0   ;;  %s1866_s22 = smov 0  }
  0x1c   :  { %s1868_s23 = smov 0  }
  0x1d LB: > { %2347 = sst [smem:[#allocation21_spill]] %s1732_s16  ;;  %s47_s24 = sadd.s32 1, %s1752_s21  ;;  %s1760_s23 = sphi %s1868_s23, %s38_s23   ;;  %s1756_s22 = sphi %s1866_s22, %s2421_s22   ;;  %s1752_s21 = sphi %s1864_s21, %s2412_s21   ;;  %s1748_s20 = sphi %s1862_s20, %s2420_s20   ;;  %s1744_s19 = sphi %s1860_s19, %s2411_s19   ;;  %s1740_s18 = sphi %s1858_s18, %s2419_s18   ;;  %s1736_s17 = sphi %s1856_s17, %s2418_s17   ;;  %s1732_s16 = sphi %s1854_s16, %s2417_s16   ;;  %s1728_s15 = sphi %s1852_s15, %s2416_s15   ;;  %s1724_s30 = sphi %s1850_s30, %s2415_s30   ;;  %s1720_s29 = sphi %s1848_s29, %s2414_s29  }
  0x1e   : > { %2348 = sst [smem:[#allocation22_spill]] %s1748_s20  ;;  %s50_s25 = sadd.s32 1, %s1756_s22 }
  0x1f   : > { %2349 = sst [smem:[#allocation23_spill]] %s1752_s21  ;;  %p48_p0 = scmp.ge.s32.totalorder %s47_s24, 2 }
  0x20   : > { %s87_s26 = sadd.s32 1, %s1740_s18  ;;  %p94_p1 = scmp.ne.s32.totalorder %s1740_s18, %s1736_s17 }
  0x21   : > { %p2314_p2 = scmp.eq.s32.totalorder %s1760_s23, 0  ;;  %s2423_s24 = smov (%p48_p0, %s47_s24), 0 }
  0x22   : > { %2350 = sst [smem:[#allocation24_spill]] %s2423_s24  ;;  %s2425_s25 = smov (!%p48_p0, %s50_s25), %s1756_s22 }
  0x23   : > { %s82_s27 = ssub.s32 %s1752_s21, %s2423_s24  ;;  %p1919_p3 = por %p2314_p2, %p94_p1 }
  0x24   : > { %p52_p4 = scmp.ge.s32.totalorder %s2425_s25, 2  ;;  %p2313_p5 = scmp.lt.s32.totalorder %s1760_s23, 4 }
  0x25   : > { %s2310_s14 = sand.u32 1, %s1740_s18   ;;  %s1254_s13 = sshll.u32 %s1752_s21, 1 }
  0x26   : > { %s2427_s25 = smov (%p52_p4, %s2425_s25), 0  ;;  %s1929_s12 = sshll.u32 %s2310_s14, 2 }
  0x27   : > { %2352 = sst [smem:[#allocation25_spill]] %s2427_s25  ;;  %s1934_s24 = ssub.s32 %s1756_s22, %s2427_s25 }
  0x28   : > { %s1937_s3 = sadd.s32 %s1756_s22, %s1254_s13  ;;  %s84_s10 = sor.u32 %s1934_s24, %s82_s27 }
  0x29   : > { %p85_p7 = scmp.eq.s32.totalorder %s84_s10, 0  ;;  %s1255_s5 = sshll.u32 %s1937_s3, 6 }
  0x2a   : > { %p1946_p8 = pnand %p2313_p5, %p1919_p3  ;;  %s493_s14 = sand.u32 1, %s1760_s23  }
  0x2b   : > { %s1952_s25 = scalar_select %p85_p7, %s1740_s18, %s87_s26  }
  0x2c   : > { %s2355_s2 = sld [smem:[#allocation32_spill]]  ;;  %s497_s27 = scalar_lea.vmem [#allocation5], %s1929_s12 }
  0x2d   : > { %2354 = sst [smem:[#allocation26_spill]] %s1952_s25  ;;  %s506_s9 = sshll.u32 %s497_s27, 4  ;;  %s507_s9 = int_to_ptr.vmem [resolvable:$true] %s506_s9 }
  0x2e   : > { %s1960_s10 = scalar_lea.sflag [#allocation6], %s493_s14  ;;  %p2315_p9 = pneg %p1946_p8 }
  0x2f   : > { %s1471_s28 = scalar_lea.vmem %s507_s9, 64  ;;  %s1762_s26 = smov [#allocation5]  }
  0x30   : > { %p1472_p10 = scmp.ne.s32.totalorder %s507_s9, %s1471_s28  ;;  %s1476_s25 = sshll.u32 %s1762_s26, 4  ;;  %s1477_s25 = int_to_ptr.vmem [resolvable:$false] %s1476_s25 }
  0x31   : > { %s1478_s7 = scalar_lea.vmem %s1477_s25, 128  ;;  %p1479_p13 = scmp.lt.s32.totalorder %s507_s9, %s1477_s25 }
  0x32   : > { %s504_s8 = scalar_lea.hbm %s2355_s2, %s1255_s5  ;;  %p1474_p11 = pnand %p1472_p10, %p2315_p9 }
  0x33   : > { %p1480_p0 = scmp.lt.s32.totalorder %s1478_s7, %s1471_s28 }
  0x34   : > { %p1475_p12 = pneg %p1474_p11 }
  0x35   : > { %p1481_p3 = por %p1480_p0, %p1479_p13 }
  0x37   : > { %p1482_p4 = pnand %p1481_p3, %p1475_p12 }
  0x39   : > { %1485 = shalt.err (!%p1482_p4)
}
  0x3a   : > { %1337 = dma.hbm_to_vmem [thread:$0]  (!%p1946_p8), %s504_s8, 64, %s507_s9, %s1960_s10  }
  0x3b   : > { %s1971_s14 = sadd.s32 4294967295, %s1760_s23   ;;  %s2317_s7 = sadd.s32 4294967294, %s1760_s23  }
  0x3c   : > { %p100_p7 = scmp.ne.s32.totalorder %s1736_s17, %s1732_s16  ;;  %p2316_p10 = scmp.eq.s32.totalorder %s1971_s14, 0 }
  0x3d   : > { %p180_p11 = scmp.ne.s32.totalorder %s1724_s30, %s1720_s29  ;;  %p2323_p12 = scmp.eq.s32.totalorder %s1971_s14, 3 }
  0x3e   : > { %p1982_p13 = por %p2316_p10, %p100_p7  ;;  %p359_p0 = scmp.eq.s32.totalorder %s2317_s7, 3 }
  0x3f   : > { %p1990_p3 = por %p180_p11, %p2316_p10  ;;  %p1999_p4 = por %p2323_p12, %p94_p1 }
  0x40   : > { %s2356_s21 = scalar_select %p1982_p13, 1, 0 }
  0x41   : > { %s2357_s8 = scalar_select %p1990_p3, 1, 0 }
  0x42   : > { %s2358_s9 = scalar_select %p1999_p4, 1, 0 }
  0x43   : > { %p2003_p5 = por %p359_p0, %p100_p7  ;;  %p2007_p2 = por %p359_p0, %p180_p11 }
  0x44   : > { %2359 = sst [smem:[#allocation27_spill]] %s2358_s9  ;;  %p1250_p6 = scmp.ge.s32.totalorder %s1760_s23, 1 }
  0x45   : > { %s2360_s29 = scalar_select %p2003_p5, 1, 0 }
  0x46   : > { %s2362_s25 = scalar_select %p2007_p2, 1, 0 }
  0x47   : > { %2361 = sst [smem:[#allocation28_spill]] %s2360_s29  ;;  %p420_p9 = scmp.lt.s32.totalorder %s1760_s23, 5 }
  0x48   : > { %2363 = sst [smem:[#allocation29_spill]] %s2362_s25  ;;  %s1763_s27 = smov [#allocation8]  }
  0x49   : > { %p2013_p10 = pnand %p1250_p6, %p420_p9  ;;  %s436_s28 = sshll.u32 %s1763_s27, 4  ;;  %s2017_s28 = int_to_ptr.vmem [resolvable:$true] %s436_s28 }
  0x4a   : > { %s2365_s1 = sld [smem:[#allocation31_spill]]  ;;  %s477_s25 = scalar_lea.vmem [#allocation2], %s1929_s12 }
  0x4b   : > { %s2364_s13 = scalar_select %p2013_p10, 1, 0 }
  0x4c   : > { %p1327_p1 = pneg %p2013_p10  ;;  %s486_s29 = sshll.u32 %s477_s25, 4  ;;  %s487_s29 = int_to_ptr.vmem [resolvable:$true] %s486_s29 }
  0x4d   : > { %p2366_p7 = scmp.eq.s32.totalorder %s1971_s14, 0  ;;  %s2368_s9 = sand.u32 1, %s1740_s18  }
  0x4e   : > { %s474_s0 = scalar_lea.sflag [#allocation3], %s2368_s9  ;;  %s1499_s27 = scalar_lea.vmem %s487_s29, 64 }
  0x4f   : > { %p2029_p11 = pnand %p1327_p1, %p2366_p7  ;;  %p1500_p6 = scmp.ne.s32.totalorder %s487_s29, %s1499_s27 }
  0x50   : > { %s484_s2 = scalar_lea.hbm %s2365_s1, %s1255_s5  ;;  %p2369_p9 = pneg %p1946_p8 }
  0x51   : > { %s1764_s3 = smov [#allocation2]  }
  0x52   : > { %p1502_p0 = pnand %p1500_p6, %p2369_p9  ;;  %s1504_s20 = sshll.u32 %s1764_s3, 4  ;;  %s1505_s20 = int_to_ptr.vmem [resolvable:$false] %s1504_s20 }
  0x53   : > { %s1506_s5 = scalar_lea.vmem %s1505_s20, 128  ;;  %p1507_p2 = scmp.lt.s32.totalorder %s487_s29, %s1505_s20 }
  0x54   : > { %p1503_p12 = pneg %p1502_p0  ;;  %p1508_p5 = scmp.lt.s32.totalorder %s1506_s5, %s1499_s27 }
  0x56   : > { %p1509_p4 = por %p1508_p5, %p1507_p2 }
  0x58   : > { %p1510_p1 = pnand %p1509_p4, %p1503_p12 }
  0x5a   : > { %1513 = shalt.err (!%p1510_p1)
}
  0x5b   : > { %1334 = dma.hbm_to_vmem [thread:$0]  (!%p1946_p8), %s484_s2, 64, %s487_s29, %s474_s0  }
  0x5c   : > { %p1516_p7 = pneg %p2029_p11  ;;  %s1525_s12 = scalar_lea.vmem %s2017_s28, 64 }
  0x5d   : > { %p1526_p6 = scmp.ne.s32.totalorder %s2017_s28, %s1525_s12  ;;  %p1533_p3 = scmp.lt.s32.totalorder %s2017_s28, %s2017_s28 }
  0x5e   : > { %p1534_p13 = scmp.lt.s32.totalorder %s1525_s12, %s1525_s12 }
  0x5f   : > { %p1528_p9 = pnand %p1526_p6, %p1516_p7 }
  0x60   : > { %p1535_p10 = por %p1534_p13, %p1533_p3 }
  0x61   : > { %p1529_p0 = pneg %p1528_p9 }
  0x63   : > { %p1536_p2 = pnand %p1535_p10, %p1529_p0 }
  0x65   : > { %1539 = shalt.err (!%p1536_p2)
}
  0x66   : > { %1330 = dma.hbm_to_vmem [thread:$0]  (!%p2029_p11), %s2297_s6, 64, %s2017_s28, [#allocation9]  }
  0x67   : > { %s1260_s0 = sshll.u32 %s1756_s22, 6  ;;  %s167_s2 = sadd.s32 1, %s1728_s15 }
  0x68   : > { %p174_p5 = scmp.ne.s32.totalorder %s1728_s15, %s1724_s30  ;;  %p2370_p8 = scmp.eq.s32.totalorder %s1934_s24, 0 }
  0x69   : > { %p2371_p10 = scmp.eq.s32.totalorder %s1760_s23, 0  ;;  %p2372_p13 = scmp.eq.s32.totalorder %s1971_s14, 3 }
  0x6a   : > { %s2059_s16 = scalar_select %p2370_p8, %s1728_s15, %s167_s2  }
  0x6b   : > { %p176_p12 = por %p174_p5, %p2371_p10  ;;  %p2065_p3 = por %p2372_p13, %p174_p5 }
  0x6c   : > { %s522_s9 = sand.u32 1, %s1728_s15   ;;  %p2374_p4 = scmp.lt.s32.totalorder %s1760_s23, 4 }
  0x6d   : > { %s1259_s29 = sshll.u32 %s522_s9, 2  ;;  %s2376_s4 = sld [smem:[#allocation34_spill]] }
  0x6e   : > { %p2072_p1 = pnand %p2374_p4, %p176_p12  ;;  %s524_s27 = scalar_lea.vmem [#allocation7], %s1259_s29 }
  0x6f   : > { %s531_s3 = sshll.u32 %s524_s27, 4  ;;  %s1765_s12 = smov [#allocation7]   ;;  %s532_s3 = int_to_ptr.vmem [resolvable:$true] %s531_s3 }
  0x70   : > { %p1542_p11 = pneg %p2072_p1  ;;  %s1553_s5 = scalar_lea.vmem %s532_s3, 64 }
  0x71   : > { %p1554_p7 = scmp.ne.s32.totalorder %s532_s3, %s1553_s5  ;;  %s1558_s11 = sshll.u32 %s1765_s12, 4  ;;  %s1559_s11 = int_to_ptr.vmem [resolvable:$false] %s1558_s11 }
  0x72   : > { %s1560_s20 = scalar_lea.vmem %s1559_s11, 128  ;;  %p1561_p0 = scmp.lt.s32.totalorder %s532_s3, %s1559_s11 }
  0x73   : > { %s529_s24 = scalar_lea.hbm %s2376_s4, %s1260_s0  ;;  %p1556_p6 = pnand %p1554_p7, %p1542_p11 }
  0x74   : > { %p1562_p2 = scmp.lt.s32.totalorder %s1560_s20, %s1553_s5 }
  0x75   : > { %p1557_p9 = pneg %p1556_p6 }
  0x76   : > { %p1563_p5 = por %p1562_p2, %p1561_p0 }
  0x78   : > { %p1564_p8 = pnand %p1563_p5, %p1557_p9 }
  0x7a   : > { %1567 = shalt.err (!%p1564_p8)
}
  0x7b   : > { %1340 = dma.hbm_to_vmem [thread:$0]  (!%p2072_p1), %s529_s24, 64, %s532_s3, %s1960_s10  }
  0x7c   : > { %p2377_p10 = scmp.ne.s32.totalorder %s2364_s13, 0 }
  0x7d   : > { %s2087_s0 = sand.u32 (!%p2377_p10), 1, %s1736_s17   ;;  %p2378_p12 = scmp.ne.s32.totalorder (!%p2377_p10), %s2356_s21, 0 }
  0x7e   : > { %540 = sbr.rel (%p2377_p10) target bundleno = 907 (0x38b), region = 68  ;;  %s2090_s2 = sshll.u32 (!%p2377_p10), %s2087_s0, 2 }
  0x7f   : > { %s543_s9 = scalar_lea.sflag (!%p2377_p10), [#allocation3], %s2087_s0 }
  0x83   : > { %1691 = dma.done.wait (%p2378_p12), %s543_s9, 64  }
  0x84   : > { %1693 = vsyncadd (%p2378_p12), %s543_s9, 4294967232  ;;  %s2330_s10 = sand.u32 1, %s1971_s14  }
  0x85   : > { %s552_s13 = scalar_lea.sflag [#allocation6], %s2330_s10 }
  0x86   : > { %1695 = dma.done.wait (%p2378_p12), %s552_s13, 64  }
  0x87   : > { %1697 = vsyncadd (%p2378_p12), %s552_s13, 4294967232  ;;  %s562_s28 = sand.u32 1, %s1724_s30   ;;  %p2379_p13 = scmp.ne.s32.totalorder %s2357_s8, 0 }
  0x88   : > { %s2107_s26 = sshll.u32 %s562_s28, 2 }
  0x89   : > { %1699 = dma.done.wait (%p2379_p13), %s552_s13, 64  }
  0x8a   : > { %1701 = vsyncadd (%p2379_p13), %s552_s13, 4294967232  ;;  %p2380_p4 = scmp.eq.s32.totalorder %s1971_s14, 0 }
  0x8c   : > { %1703 = dma.done.wait (%p2380_p4), [#allocation9], 64   ;;  %p2381_p1 = pmov %p2380_p4 }
  0x8d   : > { %s2382_s21 = sld [smem:[#allocation22_spill]]  ;;  %p645_p11 = scmp.lt.s32.totalorder %s1744_s19, 1  ;;  %v1766_v0 = vmov 0.0   ;;  %vm1767_vm0 = vmmov 0   ;;  %v1768_v1 = vmov 0   ;;  %vm665_vm1 = vcmask 64512  }
  0x8e   : > { %1705 = vsyncadd (%p2381_p1), [#allocation9], 4294967232  ;;  %1296 = vmatprep.subr.mxu0 %v1766_v0  ;;  %1298 = vmatprep.mubr.msk.f32.mxu0 %vm1767_vm0, %v1766_v0  ;;  %s2383_s20 = sld [smem:[#allocation30_spill]]  ;;  %v658_v2 = vld [vmem:[#allocation8] sm:$0xf]  ;;  %vm751_vm2 = vcmask 1043456  }
  0x8f   : > { %s646_s27 = scalar_select %p645_p11, %s1744_s19, 1  ;;  %1448 = vset.pattern.permute.xlu0 %v1768_v1  ;;  %1301 = vmatprep.subr.mxu1 %v1766_v0  ;;  %vm747_vm3 = vcmask 31744  }
  0x90   : > { %1303 = vmatprep.mubr.msk.f32.mxu1 %vm1767_vm0, %v1766_v0  ;;  %1449 = vset.pattern.permute.xlu1 %v1768_v1  ;;  %s2384_s10 = sld [smem:[#allocation36_spill]]  ;;  %s2390_s28 = scalar_lea.vmem [#allocation5], %s2090_s2 }
  0x91   : > { %s1269_s8 = sshll.u32 %s646_s27, 1  ;;  %s2385_s25 = sld [smem:[#allocation38_spill]]  ;;  %v918_v28 = vld [vmem:[%s2390_s28] sm:$0xf] }
  0x92   : > { %s2387_s24 = sld [smem:[#allocation40_spill]]  ;;  %p1278_p6 = scmp.ne.s32.totalorder %s1744_s19, 0 }
  0x93   : > { %p647_p7 = scmp.lt.s32.totalorder %s2382_s21, 1  ;;  %s2388_s12 = sld [smem:[#allocation35_spill]] }
  0x94   : > { %s2392_s29 = sld [smem:[#allocation33_spill]] }
  0x95   : > { %s2429_s21 = smov (!%p647_p7, %s2382_s21), 1 }
  0x96   : > { %s650_s3 = sadd.s32 %s1269_s8, %s2429_s21  ;;  %v659_v3 = vld [vmem:[%s2384_s10] sm:$0xf]  ;;  %s2386_s8 = sld [smem:[#allocation37_spill]] }
  0x97   : > { %s1270_s5 = sshll.u32 %s650_s3, 3  ;;  %662 = vperm.xlu0 %1448, %v659_v3   ;;  %v741_v5 = vld [vmem:[%s2385_s25] sm:$0xff]  ;;  %s1271_s13 = sshll.u32 %s2429_s21, 2 }
  0x98   : > { %s652_s9 = scalar_lea.vmem %s2383_s20, %s1270_s5  ;;  %v827_v12 = vld [vmem:[%s2387_s24] sm:$0xf]  ;;  %s2391_s10 = scalar_lea.vmem [#allocation7], %s2107_s26 }
  0x99   : > { %v657_v4 = vld [vmem:[%s652_s9] sm:$0xff]  ;;  %830 = vperm.xlu1 %1449, %v827_v12   ;;  %s2389_s9 = sld [smem:[#allocation39_spill]]  ;;  %v916_v29 = vld [vmem:[%s2391_s10] sm:$0xf]  ;;  %s637_s24 = scalar_lea.vmem [#allocation11], %s2090_s2 }
  0x9a   : > { %1297 = vmatpush3.msra.mxu0 %v657_v4  ;;  %v917_v13 = vld [vmem:[%s2388_s12] sm:$0xf]  ;;  %s656_s25 = scalar_lea.vmem %s2392_s29, %s1271_s13  ;;  %v919_v30 = vmul.f32 %v918_v28, %v916_v29  ;;  %s2393_s21 = scalar_lea.vmem [#allocation2], %s2090_s2 }
  0x9b   : > { %1299 = vmatmul.mubr.msk.f32.vlgmr.msra.gmra.mxu0 %vm665_vm1, %v658_v2  ;;  %1306 = vmatprep.subr.mxu0 %v1766_v0  ;;  %v915_v31 = vld [vmem:[%s656_s25] sm:$0xf]  ;;  %s2331_s3 = scalar_lea.vmem [#allocation10], %s2090_s2  ;;  %s2168_s5 = scalar_lea.vmem [#allocation13], %s2107_s26 }
  0x9c   : > { %1308 = vmatprep.mubr.msk.f32.mxu0 %vm1767_vm0, %v1766_v0  ;;  %744 = vperm.xlu0 %1448, %v741_v5   ;;  %v740_v11 = vld [vmem:[%s2386_s8] sm:$0xff]  ;;  %v920_v32 = vadd.f32 %v919_v30, %v915_v31 }
  0x9d   : > { %927 = vperm.xlu1 %1449, %v917_v13   ;;  %v914_v35 = vld [vmem:[%s2393_s21] sm:$0xf] }
  0x9e   : > { %v932_v42 = vsub.f32 %v914_v35, %v915_v31 }
  0x9f   : > { %v826_v19 = vld [vmem:[%s2389_s9] sm:$0xf] }
 0x112   : > { %v663_v6 = vpop.permute.xlu0 %662 }
 0x114   : > { %v831_v20 = vpop.permute.xlu1 %830 }
 0x117   : > { %v745_v14 = vpop.permute.xlu0 %744 }
 0x118   : > { %v928_v40 = vpop.permute.xlu1 %927 }
 0x15b   : > { %v735_v7 = vpop.f32.mrf.mxu0 }
 0x15c   : > { %v736_v8 = vadd.f32 %v735_v7, %v663_v6 }
 0x15d   : > { %v1300_v9 = vpop.f32.mrf.mxu0 }
 0x15e   : > { %v739_v10 = vmax.f32 %v736_v8, 0.0 }
 0x160   : > { %1302 = vmatpush3.msk.msra.mxu1 %vm751_vm2, %v739_v10 }
 0x161   : > { %1304 = vmatmul.mubr.msk.f32.vlgmr.msra.gmra.mxu1 %vm747_vm3, %v740_v11 }
 0x221   : > { %v821_v15 = vpop.f32.mrf.mxu1 }
 0x222   : > { %v822_v16 = vadd.f32 %v821_v15, %v745_v14 }
 0x223   : > { %v1305_v17 = vpop.f32.mrf.mxu1 }
 0x224   : > { %v825_v18 = vmax.f32 %v822_v16, 0.0 }
 0x226   : > { %1307 = vmatpush3.msra.mxu0 %v825_v18 }
 0x227   : > { %1309 = vmatmul.mubr.msk.f32.vlgmr.msra.gmra.mxu0 %vm665_vm1, %v826_v19 }
 0x2e7   : > { %v902_v21 = vpop.f32.mrf.mxu0 }
 0x2e8   : > { %v903_v22 = vadd.f32 %v902_v21, %v831_v20 }
 0x2e9   : > { %v1310_v23 = vpop.f32.mrf.mxu0 }
 0x2ea   : > { %v1276_v24 = vclamps-f32 %v903_v22, 5.0 }
 0x2ec   : > { %v1277_v25 = vmul.f32 -1.442695, %v1276_v24 }
 0x2ee   : > { %1450 = vpow2.f32 %v1277_v25 }
 0x2fb   : > { %v1451_v26 = vpop.eup %1450 }
 0x2fc   : > { %v911_v27 = vadd.f32 1.0, %v1451_v26 }
 0x2fe   : > { %1452 = vrcp.f32 %v911_v27 }
 0x2ff   : > { %1454 = vrcp.f32 %v916_v29 }
 0x30b   : > { %v1453_v33 = vpop.eup %1452 }
 0x30c   : > { %945 = vst [vmem:[%s637_s24] sm:$0xf] %v1453_v33  ;;  %v921_v34 = vsub.f32 1.0, %v1453_v33  ;;  %v922_v36 = vmul.f32 %v1453_v33, %v914_v35  ;;  %v1455_v43 = vpop.eup %1454 }
 0x30d   : > { %v933_v44 = vmul.f32 %v1455_v43, %v932_v42 }
 0x30e   : > { %v923_v37 = vmul.f32 %v921_v34, %v920_v32  ;;  %v934_v38 = vmul.f32 %v921_v34, %v921_v34 }
 0x30f   : > { %v935_v45 = vmul.f32 %v1453_v33, %v933_v44 }
 0x310   : > { %v924_v39 = vadd.f32 %v923_v37, %v922_v36  ;;  %1456 = vlog2.f32 %v934_v38 }
 0x311   : > { %v939_v49 = vmul.f32 %v935_v45, %v935_v45 }
 0x312   : > { %v930_v41 = vmul.f32 %v928_v40, %v924_v39 }
 0x314   : > { %944 = vst [vmem:[%s2331_s3] sm:$0xf] %v930_v41 }
 0x31d   : > { %v1457_v46 = vpop.eup %1456 }
 0x31e   : > { %v937_v47 = vmul.f32 0.6931472, %v1457_v46 }
 0x320   : > { %v938_v48 = vadd.f32 1.0, %v937_v47 }
 0x322   : > { %v940_v50 = vsub.f32 %v938_v48, %v939_v49 }
 0x324   : > { %v941_v51 = vsub.f32 %v940_v50, %v934_v38  ;;  %949 = sbr.rel (%p1278_p6) target bundleno = 811 (0x32b), region = 88 }
 0x326   : > { %v942_v52 = vmul.f32 -0.5, %v941_v51 }
 0x328   : > { %v943_v53 = vmul.f32 %v942_v52, %v928_v40 }
 0x329   : > { %v1769_v54 = vmov 0.0  }
 0x32a   : > { %950 = vst [vmem:[%s2168_s5] sm:$0xf] %v1769_v54 }
 0x32b PF: > { %p1279_p9 = scmp.ne.s32.totalorder %s1744_s19, 1 }
 0x330   : > { %957 = sbr.rel (%p1279_p9) target bundleno = 831 (0x33f), region = 92 }
 0x331   : > { %v951_v55 = vld [vmem:[%s2168_s5] sm:$0xf] }
 0x332   : > { %v952_v56 = vadd.f32 %v951_v55, %v943_v53 }
 0x334   : > { %953 = vst [vmem:[%s2168_s5] sm:$0xf] %v952_v56 }
 0x33b   : > { %v958_v57 = vld [vmem:[%s2168_s5] sm:$0xf] }
 0x33c   : > { %v959_v58 = vmul.f32 0.5, %v958_v57 }
 0x33e   : > { %960 = vst [vmem:[%s2168_s5] sm:$0xf] %v959_v58 }
 0x33f PF: > { %s2394_s26 = sld [smem:[#allocation22_spill]]  ;;  %s1283_s11 = sshll.u32 %s1744_s19, 1 }
 0x340   : > { %s2395_s12 = sld [smem:[#allocation27_spill]]  ;;  %s1002_s9 = sshll.u32 %s637_s24, 4  ;;  %s1003_s9 = int_to_ptr.vmem [resolvable:$true] %s1002_s9 }
 0x341   : > { %s2396_s27 = sld [smem:[#allocation42_spill]]  ;;  %s2397_s29 = sand.u32 1, %s1971_s14  }
 0x342   : > { %s2191_s25 = scalar_lea.sflag [#allocation12], %s2397_s29  ;;  %s1568_s21 = scalar_lea.vmem %s1003_s9, 64 }
 0x343   : > { %p1569_p0 = scmp.ne.s32.totalorder %s1003_s9, %s1568_s21  ;;  %s1770_s19 = smov [#allocation11]  }
 0x345   : > { %s2179_s20 = sadd.s32 %s2394_s26, %s1283_s11  ;;  %s1572_s11 = sshll.u32 %s1770_s19, 4  ;;  %s1573_s11 = int_to_ptr.vmem [resolvable:$false] %s1572_s11 }
 0x346   : > { %s2332_s13 = sshll.u32 %s2179_s20, 6  ;;  %p2398_p2 = scmp.ne.s32.totalorder %s2395_s12, 0 }
 0x347   : > { %s1000_s8 = scalar_lea.hbm %s2396_s27, %s2332_s13  ;;  %s1574_s3 = scalar_lea.vmem %s1573_s11, 128 }
 0x348   : > { %p1570_p5 = pnand %p1569_p0, %p2398_p2  ;;  %p1575_p10 = scmp.lt.s32.totalorder %s1003_s9, %s1573_s11 }
 0x349   : > { %p1576_p12 = scmp.lt.s32.totalorder %s1574_s3, %s1568_s21 }
 0x34a   : > { %p1571_p8 = pneg %p1570_p5 }
 0x34b   : > { %p1577_p13 = por %p1576_p12, %p1575_p10 }
 0x34d   : > { %p1578_p4 = pnand %p1577_p13, %p1571_p8 }
 0x34f   : > { %1581 = shalt.err (!%p1578_p4)
}
 0x350   : > { %s1582_s24 = scalar_lea.hbm %s1000_s8, 64  ;;  %s1586_s10 = scalar_lea.hbm %s2396_s27, 256 }
 0x351   : > { %p1583_p1 = scmp.ne.s32.totalorder %s1000_s8, %s1582_s24  ;;  %p1587_p6 = scmp.lt.s32.totalorder %s1000_s8, %s2396_s27 }
 0x352   : > { %p1588_p9 = scmp.lt.s32.totalorder %s1586_s10, %s1582_s24 }
 0x353   : > { %p1584_p11 = pnand %p1583_p1, %p2398_p2 }
 0x354   : > { %p1589_p0 = por %p1588_p9, %p1587_p6 }
 0x355   : > { %p1585_p7 = pneg %p1584_p11 }
 0x357   : > { %p1590_p5 = pnand %p1589_p0, %p1585_p7 }
 0x359   : > { %1593 = shalt.err (!%p1590_p5)
}
 0x35a   : > { %1322 = dma.vmem_to_hbm [thread:$0]  (%p2398_p2), %s1003_s9, 64, %s1000_s8, %s2191_s25  }
 0x35b   : > { %s2399_s3 = sshll.u32 %s2179_s20, 6  ;;  %s2400_s11 = sld [smem:[#allocation41_spill]] }
 0x35c   : > { %s2401_s13 = scalar_lea.vmem [#allocation10], %s2090_s2  ;;  %s1287_s28 = sshll.u32 %s2394_s26, 6 }
 0x35d   : > { %s987_s24 = sshll.u32 %s2401_s13, 4  ;;  %s962_s10 = scalar_lea.sflag [#allocation4], %s2087_s0  ;;  %s988_s24 = int_to_ptr.vmem [resolvable:$true] %s987_s24 }
 0x35e   : > { %s1594_s29 = scalar_lea.vmem %s988_s24, 64  ;;  %s1771_s1 = smov [#allocation10]  }
 0x35f   : > { %p1595_p8 = scmp.ne.s32.totalorder %s988_s24, %s1594_s29  ;;  %s1598_s4 = sshll.u32 %s1771_s1, 4  ;;  %s1599_s4 = int_to_ptr.vmem [resolvable:$false] %s1598_s4 }
 0x360   : > { %s1600_s9 = scalar_lea.vmem %s1599_s4, 128  ;;  %p1601_p13 = scmp.lt.s32.totalorder %s988_s24, %s1599_s4 }
 0x361   : > { %s2211_s14 = scalar_lea.hbm %s2400_s11, %s2399_s3  ;;  %p1596_p10 = pnand %p1595_p8, %p2398_p2 }
 0x362   : > { %p1602_p4 = scmp.lt.s32.totalorder %s1600_s9, %s1594_s29 }
 0x363   : > { %p1597_p12 = pneg %p1596_p10 }
 0x364   : > { %p1603_p1 = por %p1602_p4, %p1601_p13 }
 0x366   : > { %p1604_p11 = pnand %p1603_p1, %p1597_p12 }
 0x368   : > { %1607 = shalt.err (!%p1604_p11)
}
 0x369   : > { %s1608_s2 = scalar_lea.hbm %s2211_s14, 64  ;;  %s1612_s1 = scalar_lea.hbm %s2400_s11, 256 }
 0x36a   : > { %p1609_p7 = scmp.ne.s32.totalorder %s2211_s14, %s1608_s2  ;;  %p1613_p0 = scmp.lt.s32.totalorder %s2211_s14, %s2400_s11 }
 0x36b   : > { %p1614_p5 = scmp.lt.s32.totalorder %s1612_s1, %s1608_s2 }
 0x36c   : > { %p1610_p6 = pnand %p1609_p7, %p2398_p2 }
 0x36d   : > { %p1615_p8 = por %p1614_p5, %p1613_p0 }
 0x36e   : > { %p1611_p9 = pneg %p1610_p6 }
 0x370   : > { %p1616_p10 = pnand %p1615_p8, %p1611_p9 }
 0x372   : > { %1619 = shalt.err (!%p1616_p10)
}
 0x373   : > { %1321 = dma.vmem_to_hbm [thread:$0]  (%p2398_p2), %s988_s24, 64, %s2211_s14, %s962_s10  }
 0x374   : > { %s2402_s21 = sld [smem:[#allocation43_spill]]  ;;  %s1015_s29 = sshll.u32 %s2168_s5, 4  ;;  %s1016_s29 = int_to_ptr.vmem [resolvable:$true] %s1015_s29 }
 0x375   : > { %s1620_s9 = scalar_lea.vmem %s1016_s29, 64  ;;  %s1772_s2 = smov [#allocation13]  }
 0x376   : > { %p1621_p12 = scmp.ne.s32.totalorder %s1016_s29, %s1620_s9  ;;  %s1624_s0 = sshll.u32 %s1772_s2, 4  ;;  %s1625_s0 = int_to_ptr.vmem [resolvable:$false] %s1624_s0 }
 0x377   : > { %s1626_s26 = scalar_lea.vmem %s1625_s0, 128  ;;  %p1627_p1 = scmp.lt.s32.totalorder %s1016_s29, %s1625_s0 }
 0x378   : > { %p1622_p13 = pnand %p1621_p12, %p2065_p3  ;;  %p1628_p11 = scmp.lt.s32.totalorder %s1626_s26, %s1620_s9 }
 0x37a   : > { %s2403_s13 = smov %s2402_s21  ;;  %s1013_s19 = scalar_lea.hbm %s2402_s21, %s1287_s28 }
 0x37b   : > { %p1623_p4 = pneg %p1622_p13  ;;  %p1629_p7 = por %p1628_p11, %p1627_p1 }
 0x37d   : > { %p1630_p6 = pnand %p1629_p7, %p1623_p4 }
 0x37f   : > { %1633 = shalt.err (!%p1630_p6)
}
 0x380   : > { %s1634_s12 = scalar_lea.hbm %s1013_s19, 64  ;;  %s1638_s24 = scalar_lea.hbm %s2403_s13, 128 }
 0x381   : > { %p1635_p2 = scmp.ne.s32.totalorder %s1013_s19, %s1634_s12  ;;  %p1639_p5 = scmp.lt.s32.totalorder %s1013_s19, %s2403_s13 }
 0x382   : > { %p1640_p8 = scmp.lt.s32.totalorder %s1638_s24, %s1634_s12 }
 0x383   : > { %p1636_p9 = pnand %p1635_p2, %p2065_p3 }
 0x384   : > { %p1641_p10 = por %p1640_p8, %p1639_p5 }
 0x385   : > { %p1637_p0 = pneg %p1636_p9 }
 0x387   : > { %p1642_p12 = pnand %p1641_p10, %p1637_p0 }
 0x389   : > { %1645 = shalt.err (!%p1642_p12)
}
 0x38a   : > { %1323 = dma.vmem_to_hbm [thread:$0]  (%p2065_p3), %s1016_s29, 64, %s1013_s19, %s2191_s25  }
 0x38b PF: > { %s2404_s1 = sld [smem:[#allocation21_spill]]  ;;  %p1354_p13 = scmp.ge.s32.totalorder %s1760_s23, 2 }
 0x38c   : > { %s2405_s20 = sld [smem:[#allocation28_spill]] }
 0x391   : > { %s1027_s8 = sand.u32 1, %s2404_s1  }
 0x392   : > { %p2406_p4 = scmp.ne.s32.totalorder %s2405_s20, 0  ;;  %s1028_s4 = scalar_lea.sflag [#allocation4], %s1027_s8 }
 0x394   : > { %p1342_p1 = pnand %p1354_p13, %p2406_p4 }
 0x396   : > { %p1343_p11 = pneg %p1342_p1 }
 0x398   : > { %1707 = dma.done.wait (%p1343_p11), %s1028_s4, 64  }
 0x399   : > { %1709 = vsyncadd (%p1343_p11), %s1028_s4, 4294967232  ;;  %s2407_s3 = sadd.s32 4294967294, %s1760_s23  }
 0x39a   : > { %s1036_s21 = sand.u32 1, %s2407_s3  }
 0x39b   : > { %s1037_s9 = scalar_lea.sflag [#allocation12], %s1036_s21 }
 0x39c   : > { %1711 = dma.done.wait (%p1343_p11), %s1037_s9, 64  }
 0x39d   : > { %1713 = vsyncadd (%p1343_p11), %s1037_s9, 4294967232  ;;  %s2408_s7 = sld [smem:[#allocation29_spill]] }
 0x3a3   : > { %p2409_p3 = scmp.ne.s32.totalorder %s2408_s7, 0 }
 0x3a5   : > { %p1348_p7 = pnand %p1354_p13, %p2409_p3 }
 0x3a7   : > { %p1349_p6 = pneg %p1348_p7 }
 0x3a9   : > { %1715 = dma.done.wait (%p1349_p6), %s1037_s9, 64  }
 0x3aa   : > { %1717 = vsyncadd (%p1349_p6), %s1037_s9, 4294967232  ;;  %s38_s23 = sadd.s32 1, %s1760_s23   ;;  %s2410_s25 = sld [smem:[#allocation26_spill]] }
 0x3ab   : > { %p35_p2 = scmp.ge.s32.totalorder %s38_s23, 6   ;;  %s2411_s19 = sld [smem:[#allocation23_spill]] }
 0x3ac   : > { %s2412_s21 = sld [smem:[#allocation24_spill]]  ;;  %s2414_s29 = smov %s1724_s30 }
 0x3ad   : > { %s2413_s2 = sld [smem:[#allocation25_spill]]  ;;  %s2415_s30 = smov %s1728_s15 }
 0x3ae   : > { %s2416_s15 = smov %s2059_s16  ;;  %s2417_s16 = smov %s1736_s17 }
 0x3af   : > { %s2418_s17 = smov %s1740_s18  ;;  %s2420_s20 = smov %s1756_s22 }
 0x3b0   : > { %s2419_s18 = smov %s2410_s25  ;;  %37 = sbr.rel (!%p35_p2) target bundleno = 29 (0x1d), region = 187 }
 0x3b3   : > { %s2421_s22 = smov %s2413_s2 }
 0x3b5   :  { %1051 = vsyncpa [#allocation3], 1 }
 0x3b6   :  { %1053 = vsyncpa [#allocation3 + $0x1], 1 }
 0x3b7   :  { %1054 = vsyncpa [#allocation6], 1 }
 0x3b8   :  { %1056 = vsyncpa [#allocation6 + $0x1], 1 }
 0x3b9   :  { %1057 = vsyncpa [#allocation9], 1 }
 0x3ba   :  { %1058 = vsyncpa [#allocation4], 1 }
 0x3bb   :  { %1060 = vsyncpa [#allocation4 + $0x1], 1 }
 0x3bc   :  { %1061 = vsyncpa [#allocation12], 1 }
 0x3bd   :  { %1063 = vsyncpa [#allocation12 + $0x1], 1 }

</bundles_post_ra>
